<compile_context>
chip_gen: v7x
topology: tpu7x:2x2x1
jax: 0.10.0
libtpu: 0.0.40
codegen_flags: <defaults>
</compile_context>

<pallas_src>
import math
import functools

import jax
import jax.numpy as jnp
from jax import lax
from jax.experimental import pallas as pl
from jax.experimental.pallas import tpu as pltpu


_NEG_BIG = -1e30  # stands in for -inf of masked_fill (avoids NaN for all-masked rows)


def _layer_norm(x, gamma, beta, eps=1e-5):
    mu = jnp.mean(x, axis=-1, keepdims=True)
    var = jnp.mean((x - mu) ** 2, axis=-1, keepdims=True)
    return (x - mu) * lax.rsqrt(var + eps) * gamma + beta


# ---------------------------------------------------------------------------
# Kernel 1: LayerNorm + QKV projection -> head-major bf16 Q/K/V in HBM
# ---------------------------------------------------------------------------
def _qkv_kernel(x_ref, ln1_g_ref, ln1_b_ref,
                wq_ref, bq_ref, wk_ref, bk_ref, wv_ref, bv_ref,
                q_ref, k_ref, v_ref, *, n_heads, d_head):
    xn = _layer_norm(x_ref[0], ln1_g_ref[...], ln1_b_ref[...]).astype(jnp.bfloat16)
    scale = jnp.float32(1.0 / math.sqrt(d_head))
    # per-head projection with head-major weights (no lane-offset slicing, no
    # in-kernel transposes); H is small so the static unroll is cheap.
    for h in range(n_heads):
        q_h = jnp.dot(xn, wq_ref[h], preferred_element_type=jnp.float32) + bq_ref[h]
        q_ref[0, h] = (q_h * scale).astype(jnp.bfloat16)     # pre-scaled, pre-cast
        k_h = jnp.dot(xn, wk_ref[h], preferred_element_type=jnp.float32) + bk_ref[h]
        k_ref[0, h] = k_h.astype(jnp.bfloat16)
        v_h = jnp.dot(xn, wv_ref[h], preferred_element_type=jnp.float32) + bv_ref[h]
        v_ref[0, h] = v_h.astype(jnp.bfloat16)


# ---------------------------------------------------------------------------
# Kernel 2: flash-style attention over precomputed head-major Q/K/V
# ---------------------------------------------------------------------------
def _attention_kernel(bias_ref, q_ref, k_ref, v_ref, o_ref,
                      m_sc, l_sc, acc_sc, *, n_heads, d_head):
    ki = pl.program_id(2)
    n_kv = pl.num_programs(2)

    @pl.when(ki == 0)
    def _init():
        m_sc[...] = jnp.full(m_sc.shape, -jnp.inf, m_sc.dtype)
        l_sc[...] = jnp.zeros(l_sc.shape, l_sc.dtype)
        acc_sc[...] = jnp.zeros(acc_sc.shape, acc_sc.dtype)

    q = q_ref[0]                       # (H, TQ, dh) bf16, already scaled by 1/sqrt(dh)
    k = k_ref[0]                       # (H, TK, dh) bf16
    v = v_ref[0]                       # (H, TK, dh) bf16
    bias = bias_ref[0]                 # (1, TK)   additive key-padding bias

    # batched-over-heads QK^T (contract last dims, no explicit transpose)
    s = jnp.einsum("hqd,hkd->hqk", q, k, preferred_element_type=jnp.float32)
    s = s + bias[None, :, :]           # single mask add per tile

    m_prev = m_sc[...]
    m_new = jnp.maximum(m_prev, jnp.max(s, axis=-1, keepdims=True))
    alpha = jnp.exp(m_prev - m_new)
    p = jnp.exp(s - m_new)
    l_sc[...] = alpha * l_sc[...] + jnp.sum(p, axis=-1, keepdims=True)
    acc_sc[...] = alpha * acc_sc[...] + jnp.einsum(
        "hqk,hkd->hqd", p.astype(jnp.bfloat16), v, preferred_element_type=jnp.float32)
    m_sc[...] = m_new

    @pl.when(ki == n_kv - 1)
    def _finalize():
        inv_l = pl.reciprocal(l_sc[...], approx=True)         # EUP slot
        ctx = acc_sc[...] * inv_l                              # (H, TQ, dh) f32
        # merge heads into the lane-dense (TQ, D) output tile (once per query tile)
        for h in range(n_heads):
            o_ref[0, :, h * d_head:(h + 1) * d_head] = ctx[h].astype(o_ref.dtype)


# ---------------------------------------------------------------------------
# Kernel 3: out-projection + residual + LN2 + FFN (tiled over d_ff) + residual
# ---------------------------------------------------------------------------
def _out_ffn_kernel(ctx_ref, x_ref, wo_ref, bo_ref, ln2_g_ref, ln2_b_ref,
                    w1_ref, b1_ref, w2_ref, b2_ref, o_ref,
                    x1_sc, hn_sc, ffn_sc):
    fi = pl.program_id(2)
    n_f = pl.num_programs(2)

    @pl.when(fi == 0)
    def _init():
        # single full-D-contraction out-projection matmul (fills the MXU)
        attn = jnp.dot(ctx_ref[0], wo_ref[...],
                       preferred_element_type=jnp.float32) + bo_ref[...]
        x1 = attn + x_ref[0]                                   # residual (dropout = id)
        x1_sc[...] = x1
        hn_sc[...] = _layer_norm(x1, ln2_g_ref[...], ln2_b_ref[...]).astype(jnp.bfloat16)
        ffn_sc[...] = jnp.zeros(ffn_sc.shape, ffn_sc.dtype)

    mid = jnp.maximum(
        jnp.dot(hn_sc[...], w1_ref[...], preferred_element_type=jnp.float32)
        + b1_ref[...], 0.0)
    ffn_sc[...] += jnp.dot(mid.astype(jnp.bfloat16), w2_ref[...],
                           preferred_element_type=jnp.float32)

    @pl.when(fi == n_f - 1)
    def _finalize():
        out = x1_sc[...] + ffn_sc[...] + b2_ref[...]
        clamp_value = jnp.float32(jnp.finfo(jnp.float32).max - 1000.0)
        o_ref[0] = jnp.clip(out, -clamp_value, clamp_value)


# ---------------------------------------------------------------------------
# Host-side helpers
# ---------------------------------------------------------------------------
def _pick_seq_tile(T, target=256):
    # sequence tiles are multiples of 128 (lane-aligned score tiles, MXU-friendly)
    # unless the whole sequence is taken as a single block.
    if T <= target:
        return T
    for cand in (target, 128):
        if T % cand == 0:
            return cand
    return T


def _pick_ff_tile(d_ff, target=512):
    if d_ff <= target:
        return d_ff
    for cand in (target, 256, 128):
        if d_ff % cand == 0:
            return cand
    return d_ff


@functools.lru_cache(maxsize=1)
def _vmem_limit_bytes():
    try:
        cap = int(pltpu.get_tpu_info().vmem_capacity_bytes)
        # ~3/4 of physical (96 MiB on v5e/v6e, 48 MiB on v7x), capped for safety.
        return max(32 * 1024 * 1024, min(cap * 3 // 4, 100 * 1024 * 1024))
    except Exception:
        return 48 * 1024 * 1024


def prepare_params(params, n_heads):
    """One-time host-side weight preparation: bf16 casts + head-major reshapes."""
    D = params["wq"].shape[0]
    d_head = D // n_heads
    bf16 = lambda w: w.astype(jnp.bfloat16)

    def head_major_w(w):   # (D, D) -> (H, D, dh) bf16
        return jnp.transpose(w.reshape(D, n_heads, d_head), (1, 0, 2)).astype(jnp.bfloat16)

    def head_major_b(b):   # (1, D) -> (H, 1, dh) f32
        return jnp.transpose(b.reshape(1, n_heads, d_head), (1, 0, 2)).astype(jnp.float32)

    return {
        "ln1_g": params["ln1_g"].astype(jnp.float32),
        "ln1_b": params["ln1_b"].astype(jnp.float32),
        "wq_h": head_major_w(params["wq"]), "bq_h": head_major_b(params["bq"]),
        "wk_h": head_major_w(params["wk"]), "bk_h": head_major_b(params["bk"]),
        "wv_h": head_major_w(params["wv"]), "bv_h": head_major_b(params["bv"]),
        "wo": bf16(params["wo"]), "bo": params["bo"].astype(jnp.float32),
        "ln2_g": params["ln2_g"].astype(jnp.float32),
        "ln2_b": params["ln2_b"].astype(jnp.float32),
        "w1": bf16(params["w1"]), "b1": params["b1"].astype(jnp.float32),
        "w2": bf16(params["w2"]), "b2": params["b2"].astype(jnp.float32),
        # TODO(synk): optional fp8 (v7x) / int8 (v6e) quantization of wo/w1/w2 skipped
        #             (numerics change; validate against the f32 reference first).
    }


def _encoder_layer(x, pad_mask, p, n_heads, tq, tk, tf, single_buffer_weights):
    B, T, D = x.shape
    assert D % n_heads == 0
    d_head = D // n_heads
    d_ff = p["w1"].shape[1]

    TQ = tq or _pick_seq_tile(T)
    TK = tk or _pick_seq_tile(T)
    TF = tf or _pick_ff_tile(d_ff)
    assert T % TQ == 0 and T % TK == 0 and d_ff % TF == 0
    assert TQ == T or TQ % 8 == 0
    assert TK == T or TK % 128 == 0, "KV tile must be a multiple of 128 (or full T)"
    assert TF == d_ff or TF % 128 == 0, "FFN tile must be a multiple of 128 (or full d_ff)"

    vmem = _vmem_limit_bytes()

    def const_spec(shape, grid_rank):
        # grid-invariant parameter block: one VMEM buffer suffices (the second
        # pipeline buffer would only ever hold an identical copy).
        zeros = (0,) * len(shape)
        imap = (lambda b, i: zeros) if grid_rank == 2 else (lambda b, i, j: zeros)
        if single_buffer_weights:
            return pl.BlockSpec(shape, imap, pipeline_mode=pl.Buffered(1))
        return pl.BlockSpec(shape, imap)

    # ------------------- Kernel 1: LN1 + QKV projection -------------------
    qkv_shape = jax.ShapeDtypeStruct((B, n_heads, T, d_head), jnp.bfloat16)
    q_hm, k_hm, v_hm = pl.pallas_call(
        functools.partial(_qkv_kernel, n_heads=n_heads, d_head=d_head),
        out_shape=(qkv_shape, qkv_shape, qkv_shape),
        grid=(B, T // TQ),
        in_specs=[
            pl.BlockSpec((1, TQ, D), lambda b, i: (b, i, 0)),
            const_spec((1, D), 2), const_spec((1, D), 2),
            const_spec((n_heads, D, d_head), 2), const_spec((n_heads, 1, d_head), 2),
            const_spec((n_heads, D, d_head), 2), const_spec((n_heads, 1, d_head), 2),
            const_spec((n_heads, D, d_head), 2), const_spec((n_heads, 1, d_head), 2),
        ],
        out_specs=(pl.BlockSpec((1, n_heads, TQ, d_head), lambda b, i: (b, 0, i, 0)),) * 3,
        compiler_params=pltpu.CompilerParams(
            dimension_semantics=("parallel", "parallel"),
            vmem_limit_bytes=vmem),
    )(x, p["ln1_g"], p["ln1_b"],
      p["wq_h"], p["bq_h"], p["wk_h"], p["bk_h"], p["wv_h"], p["bv_h"])

    # additive key-padding bias, precomputed once: (B, 1, T), -1e30 on padded keys
    bias = (pad_mask.astype(jnp.float32) * jnp.float32(_NEG_BIG)).reshape(B, 1, T)

    # ------------------- Kernel 2: flash attention -------------------
    ctx = pl.pallas_call(
        functools.partial(_attention_kernel, n_heads=n_heads, d_head=d_head),
        out_shape=jax.ShapeDtypeStruct((B, T, D), jnp.bfloat16),
        grid=(B, T // TQ, T // TK),
        in_specs=[
            pl.BlockSpec((1, 1, TK), lambda b, qi, ki: (b, 0, ki)),
            pl.BlockSpec((1, n_heads, TQ, d_head), lambda b, qi, ki: (b, 0, qi, 0)),
            pl.BlockSpec((1, n_heads, TK, d_head), lambda b, qi, ki: (b, 0, ki, 0)),
            pl.BlockSpec((1, n_heads, TK, d_head), lambda b, qi, ki: (b, 0, ki, 0)),
        ],
        out_specs=pl.BlockSpec((1, TQ, D), lambda b, qi, ki: (b, qi, 0)),
        scratch_shapes=[
            pltpu.VMEM((n_heads, TQ, 1), jnp.float32),        # running max
            pltpu.VMEM((n_heads, TQ, 1), jnp.float32),        # running denom
            pltpu.VMEM((n_heads, TQ, d_head), jnp.float32),   # running numerator
        ],
        compiler_params=pltpu.CompilerParams(
            dimension_semantics=("parallel", "parallel", "arbitrary"),
            vmem_limit_bytes=vmem),
    )(bias, q_hm, k_hm, v_hm)

    # ------------------- Kernel 3: out-proj + FFN -------------------
    out = pl.pallas_call(
        _out_ffn_kernel,
        out_shape=jax.ShapeDtypeStruct((B, T, D), jnp.float32),
        grid=(B, T // TQ, d_ff // TF),
        in_specs=[
            pl.BlockSpec((1, TQ, D), lambda b, qi, fi: (b, qi, 0)),   # attention ctx (bf16)
            pl.BlockSpec((1, TQ, D), lambda b, qi, fi: (b, qi, 0)),   # x (residual)
            const_spec((D, D), 3),                                    # Wo
            const_spec((1, D), 3), const_spec((1, D), 3), const_spec((1, D), 3),
            pl.BlockSpec((D, TF), lambda b, qi, fi: (0, fi)),         # W1 tile
            pl.BlockSpec((1, TF), lambda b, qi, fi: (0, fi)),         # b1 tile
            pl.BlockSpec((TF, D), lambda b, qi, fi: (fi, 0)),         # W2 tile
            const_spec((1, D), 3),                                    # b2
        ],
        out_specs=pl.BlockSpec((1, TQ, D), lambda b, qi, fi: (b, qi, 0)),
        scratch_shapes=[
            pltpu.VMEM((TQ, D), jnp.float32),     # x1 (post-attn residual)
            pltpu.VMEM((TQ, D), jnp.bfloat16),    # LN2(x1)
            pltpu.VMEM((TQ, D), jnp.float32),     # FFN accumulator
        ],
        compiler_params=pltpu.CompilerParams(
            dimension_semantics=("parallel", "parallel", "arbitrary"),
            vmem_limit_bytes=vmem),
    )(ctx, x, p["wo"], p["bo"], p["ln2_g"], p["ln2_b"],
      p["w1"], p["b1"], p["w2"], p["b2"])

    return out


def encoder_layer(x, pad_mask, prepared_params, n_heads, tq=None, tk=None, tf=None):
    """x: (B, T, D) f32.  pad_mask: (B, T) with 1.0 = padded key position.
    prepared_params: output of prepare_params()."""
    try:
        return _encoder_layer(x, pad_mask, prepared_params, n_heads, tq, tk, tf, True)
    except Exception:
        # single-buffered weight blocks are a pure VMEM optimisation; fall back to
        # default double-buffering if pl.Buffered(1) is not supported by this jax.
        return _encoder_layer(x, pad_mask, prepared_params, n_heads, tq, tk, tf, False)


# ---------------------------------------------------------------------------
# Pure-JAX f32 reference (identical math) for correctness checks
# ---------------------------------------------------------------------------
def encoder_layer_ref(x, pad_mask, params, n_heads):
    B, T, D = x.shape
    d_head = D // n_heads

    def ln(v, g, b, eps=1e-5):
        mu = jnp.mean(v, axis=-1, keepdims=True)
        var = jnp.mean((v - mu) ** 2, axis=-1, keepdims=True)
        return (v - mu) * lax.rsqrt(var + eps) * g + b

    qn = ln(x, params["ln1_g"], params["ln1_b"])
    q = (qn @ params["wq"] + params["bq"]).reshape(B, T, n_heads, d_head)
    k = (qn @ params["wk"] + params["bk"]).reshape(B, T, n_heads, d_head)
    v = (qn @ params["wv"] + params["bv"]).reshape(B, T, n_heads, d_head)
    s = jnp.einsum("bqhd,bkhd->bhqk", q, k) / math.sqrt(d_head)
    s = s + (pad_mask * _NEG_BIG)[:, None, None, :]
    p = jax.nn.softmax(s, axis=-1)
    a = jnp.einsum("bhqk,bkhd->bqhd", p, v).reshape(B, T, D)
    a = a @ params["wo"] + params["bo"]
    x1 = a + x
    h = ln(x1, params["ln2_g"], params["ln2_b"])
    f = jnp.maximum(h @ params["w1"] + params["b1"], 0.0) @ params["w2"] + params["b2"]
    out = x1 + f
    cv = jnp.float32(jnp.finfo(jnp.float32).max - 1000.0)
    return jnp.clip(out, -cv, cv)


if __name__ == "__main__":
    def make_params(key, D, D_FF):
        ks = jax.random.split(key, 12)
        s = 0.1
        return {
            "ln1_g": jnp.ones((1, D), jnp.float32),
            "ln1_b": jnp.zeros((1, D), jnp.float32),
            "wq": s * jax.random.normal(ks[0], (D, D), jnp.float32),
            "bq": s * jax.random.normal(ks[1], (1, D), jnp.float32),
            "wk": s * jax.random.normal(ks[2], (D, D), jnp.float32),
            "bk": s * jax.random.normal(ks[3], (1, D), jnp.float32),
            "wv": s * jax.random.normal(ks[4], (D, D), jnp.float32),
            "bv": s * jax.random.normal(ks[5], (1, D), jnp.float32),
            "wo": s * jax.random.normal(ks[6], (D, D), jnp.float32),
            "bo": s * jax.random.normal(ks[7], (1, D), jnp.float32),
            "ln2_g": jnp.ones((1, D), jnp.float32),
            "ln2_b": jnp.zeros((1, D), jnp.float32),
            "w1": s * jax.random.normal(ks[8], (D, D_FF), jnp.float32),
            "b1": s * jax.random.normal(ks[9], (1, D_FF), jnp.float32),
            "w2": s * jax.random.normal(ks[10], (D_FF, D), jnp.float32),
            "b2": s * jax.random.normal(ks[11], (1, D), jnp.float32),
        }

    def check(B, T, D, H, D_FF, pad_fn, key, **tiles):
        kx, kp = jax.random.split(key)
        x = jax.random.normal(kx, (B, T, D), dtype=jnp.float32)
        pad = pad_fn(B, T)
        raw = make_params(kp, D, D_FF)
        prep = prepare_params(raw, H)
        out = jax.block_until_ready(encoder_layer(x, pad, prep, H, **tiles))
        ref = encoder_layer_ref(x, pad, raw, H)
        assert out.shape == (B, T, D)
        err = jnp.max(jnp.abs(out - ref))
        # kernel uses bf16 MXU operands + approx reciprocal; reference is pure f32
        assert jnp.allclose(out, ref, atol=5e-2, rtol=5e-2), f"max abs err {err}"

    key = jax.random.PRNGKey(0)
    k1, k2 = jax.random.split(key)

    # 1) small smoke test at module-consistent shapes (single tile everywhere)
    def pad_small(B, T):
        return jnp.zeros((B, T), jnp.float32).at[1, -2:].set(1.0)
    check(2, 8, 32, 4, 64, pad_small, k1)

    # 2) tiled-path test: multi-tile attention grid, a fully-masked leading KV tile,
    #    d_ff-tiled FFN contraction, and d_head=64 lane-slice head merge.
    def pad_big(B, T):
        p = jnp.zeros((B, T), jnp.float32)
        p = p.at[1, :T // 2].set(1.0)      # whole first KV tile of batch 1 masked
        p = p.at[0, -3:].set(1.0)
        return p
    check(2, 256, 128, 2, 256, pad_big, k2, tq=128, tk=128, tf=128)

    # TODO(synk): dropout / variational dropout / stochastic-depth (death_rate) are
    #             training-only and omitted (eval semantics); gated residual variant
    #             (onmt.constants.residual_type == 'gated') is not modelled.
    print("KERNEL_OK")
</pallas_src>

<mosaic_0001>
module attributes {stable_mosaic.version = 11 : i64} {
  func.func @_qkv_kernel(%arg0: i32, %arg1: i32, %arg2: memref<1x8x32xf32, #tpu.memory_space<vmem>>, %arg3: memref<1x32xf32, #tpu.memory_space<vmem>>, %arg4: memref<1x32xf32, #tpu.memory_space<vmem>>, %arg5: memref<4x32x8xbf16, #tpu.memory_space<vmem>>, %arg6: memref<4x1x8xf32, #tpu.memory_space<vmem>>, %arg7: memref<4x32x8xbf16, #tpu.memory_space<vmem>>, %arg8: memref<4x1x8xf32, #tpu.memory_space<vmem>>, %arg9: memref<4x32x8xbf16, #tpu.memory_space<vmem>>, %arg10: memref<4x1x8xf32, #tpu.memory_space<vmem>>, %arg11: memref<1x4x8x8xbf16, #tpu.memory_space<vmem>>, %arg12: memref<1x4x8x8xbf16, #tpu.memory_space<vmem>>, %arg13: memref<1x4x8x8xbf16, #tpu.memory_space<vmem>>) attributes {dimension_semantics = [#tpu.dimension_semantics<parallel>, #tpu.dimension_semantics<parallel>], iteration_bounds = array<i64: 2, 1>, scalar_prefetch = 0 : i64, scratch_operands = 0 : i64, tpu.core_type = #tpu.core_type<tc>, window_params = [{transform_indices = @transform_0, window_bounds = array<i64: 1, 8, 32>}, {pipeline_mode = #tpu.pipeline_mode<synchronous>, transform_indices = @transform_1, window_bounds = array<i64: 1, 32>}, {pipeline_mode = #tpu.pipeline_mode<synchronous>, transform_indices = @transform_2, window_bounds = array<i64: 1, 32>}, {pipeline_mode = #tpu.pipeline_mode<synchronous>, transform_indices = @transform_3, window_bounds = array<i64: 4, 32, 8>}, {pipeline_mode = #tpu.pipeline_mode<synchronous>, transform_indices = @transform_4, window_bounds = array<i64: 4, 1, 8>}, {pipeline_mode = #tpu.pipeline_mode<synchronous>, transform_indices = @transform_5, window_bounds = array<i64: 4, 32, 8>}, {pipeline_mode = #tpu.pipeline_mode<synchronous>, transform_indices = @transform_6, window_bounds = array<i64: 4, 1, 8>}, {pipeline_mode = #tpu.pipeline_mode<synchronous>, transform_indices = @transform_7, window_bounds = array<i64: 4, 32, 8>}, {pipeline_mode = #tpu.pipeline_mode<synchronous>, transform_indices = @transform_8, window_bounds = array<i64: 4, 1, 8>}, {transform_indices = @transform_9, window_bounds = array<i64: 1, 4, 8, 8>}, {transform_indices = @transform_10, window_bounds = array<i64: 1, 4, 8, 8>}, {transform_indices = @transform_11, window_bounds = array<i64: 1, 4, 8, 8>}]} {
    %c0 = arith.constant 0 : index
    %c0_0 = arith.constant 0 : index
    %c0_1 = arith.constant 0 : index
    %0 = vector.load %arg2[%c0, %c0_0, %c0_1] : memref<1x8x32xf32, #tpu.memory_space<vmem>>, vector<1x8x32xf32>
    %1 = vector.shape_cast %0 : vector<1x8x32xf32> to vector<8x32xf32>
    %c0_2 = arith.constant 0 : index
    %c0_3 = arith.constant 0 : index
    %2 = vector.load %arg3[%c0_2, %c0_3] : memref<1x32xf32, #tpu.memory_space<vmem>>, vector<1x32xf32>
    %c0_4 = arith.constant 0 : index
    %c0_5 = arith.constant 0 : index
    %3 = vector.load %arg4[%c0_4, %c0_5] : memref<1x32xf32, #tpu.memory_space<vmem>>, vector<1x32xf32>
    %cst = arith.constant dense<0.000000e+00> : vector<8xf32>
    %4 = vector.multi_reduction <add>, %1, %cst [1] : vector<8x32xf32> to vector<8xf32>
    %5 = vector.shape_cast %4 : vector<8xf32> to vector<8x1xf32>
    %cst_6 = arith.constant 3.200000e+01 : f32
    %6 = vector.broadcast %cst_6 : f32 to vector<8x1xf32>
    %7 = arith.divf %5, %6 : vector<8x1xf32>
    %8 = vector.broadcast %7 : vector<8x1xf32> to vector<8x32xf32>
    %9 = arith.subf %1, %8 : vector<8x32xf32>
    %10 = arith.mulf %9, %9 : vector<8x32xf32>
    %cst_7 = arith.constant dense<0.000000e+00> : vector<8xf32>
    %11 = vector.multi_reduction <add>, %10, %cst_7 [1] : vector<8x32xf32> to vector<8xf32>
    %12 = vector.shape_cast %11 : vector<8xf32> to vector<8x1xf32>
    %cst_8 = arith.constant 3.200000e+01 : f32
    %13 = vector.broadcast %cst_8 : f32 to vector<8x1xf32>
    %14 = arith.divf %12, %13 : vector<8x1xf32>
    %15 = vector.broadcast %7 : vector<8x1xf32> to vector<8x32xf32>
    %16 = arith.subf %1, %15 : vector<8x32xf32>
    %cst_9 = arith.constant 9.99999974E-6 : f32
    %17 = vector.broadcast %cst_9 : f32 to vector<8x1xf32>
    %18 = arith.addf %14, %17 : vector<8x1xf32>
    %19 = math.rsqrt %18 : vector<8x1xf32>
    %20 = vector.broadcast %19 : vector<8x1xf32> to vector<8x32xf32>
    %21 = arith.mulf %16, %20 : vector<8x32xf32>
    %22 = vector.broadcast %2 : vector<1x32xf32> to vector<8x32xf32>
    %23 = arith.mulf %21, %22 : vector<8x32xf32>
    %24 = vector.broadcast %3 : vector<1x32xf32> to vector<8x32xf32>
    %25 = arith.addf %23, %24 : vector<8x32xf32>
    %26 = arith.truncf %25 : vector<8x32xf32> to vector<8x32xbf16>
    %c0_10 = arith.constant 0 : index
    %c0_11 = arith.constant 0 : index
    %c0_12 = arith.constant 0 : index
    %27 = vector.load %arg5[%c0_10, %c0_11, %c0_12] : memref<4x32x8xbf16, #tpu.memory_space<vmem>>, vector<1x32x8xbf16>
    %28 = vector.shape_cast %27 : vector<1x32x8xbf16> to vector<32x8xbf16>
    %cst_13 = arith.constant dense<0.000000e+00> : vector<8x8xf32>
    %29 = tpu.matmul %26, %28, %cst_13 {dimension_numbers = #tpu.dot_dimension_numbers<[1], [0], [0], [1], [0, 0, 1, 1], [], []>} : vector<8x32xbf16>, vector<32x8xbf16>, vector<8x8xf32> -> vector<8x8xf32>
    %c0_14 = arith.constant 0 : index
    %c0_15 = arith.constant 0 : index
    %c0_16 = arith.constant 0 : index
    %30 = vector.load %arg6[%c0_14, %c0_15, %c0_16] : memref<4x1x8xf32, #tpu.memory_space<vmem>>, vector<1x1x8xf32>
    %31 = vector.shape_cast %30 : vector<1x1x8xf32> to vector<1x8xf32>
    %32 = vector.broadcast %31 : vector<1x8xf32> to vector<8x8xf32>
    %33 = arith.addf %29, %32 : vector<8x8xf32>
    %cst_17 = arith.constant 0.353553385 : f32
    %34 = vector.broadcast %cst_17 : f32 to vector<8x8xf32>
    %35 = arith.mulf %33, %34 : vector<8x8xf32>
    %36 = arith.truncf %35 : vector<8x8xf32> to vector<8x8xbf16>
    %c0_18 = arith.constant 0 : index
    %c0_19 = arith.constant 0 : index
    %c0_20 = arith.constant 0 : index
    %c0_21 = arith.constant 0 : index
    %37 = vector.load %arg11[%c0_18, %c0_19, %c0_20, %c0_21] : memref<1x4x8x8xbf16, #tpu.memory_space<vmem>>, vector<1x1x8x8xbf16>
    %38 = vector.shape_cast %37 : vector<1x1x8x8xbf16> to vector<8x8xbf16>
    %39 = vector.shape_cast %36 : vector<8x8xbf16> to vector<1x1x8x8xbf16>
    tpu.vector_store %arg11[%c0_18, %c0_19, %c0_20, %c0_21], %39 {strides = array<i32>} : memref<1x4x8x8xbf16, #tpu.memory_space<vmem>>, vector<1x1x8x8xbf16>,
    %c0_22 = arith.constant 0 : index
    %c0_23 = arith.constant 0 : index
    %c0_24 = arith.constant 0 : index
    %40 = vector.load %arg7[%c0_22, %c0_23, %c0_24] : memref<4x32x8xbf16, #tpu.memory_space<vmem>>, vector<1x32x8xbf16>
    %41 = vector.shape_cast %40 : vector<1x32x8xbf16> to vector<32x8xbf16>
    %cst_25 = arith.constant dense<0.000000e+00> : vector<8x8xf32>
    %42 = tpu.matmul %26, %41, %cst_25 {dimension_numbers = #tpu.dot_dimension_numbers<[1], [0], [0], [1], [0, 0, 1, 1], [], []>} : vector<8x32xbf16>, vector<32x8xbf16>, vector<8x8xf32> -> vector<8x8xf32>
    %c0_26 = arith.constant 0 : index
    %c0_27 = arith.constant 0 : index
    %c0_28 = arith.constant 0 : index
    %43 = vector.load %arg8[%c0_26, %c0_27, %c0_28] : memref<4x1x8xf32, #tpu.memory_space<vmem>>, vector<1x1x8xf32>
    %44 = vector.shape_cast %43 : vector<1x1x8xf32> to vector<1x8xf32>
    %45 = vector.broadcast %44 : vector<1x8xf32> to vector<8x8xf32>
    %46 = arith.addf %42, %45 : vector<8x8xf32>
    %47 = arith.truncf %46 : vector<8x8xf32> to vector<8x8xbf16>
    %c0_29 = arith.constant 0 : index
    %c0_30 = arith.constant 0 : index
    %c0_31 = arith.constant 0 : index
    %c0_32 = arith.constant 0 : index
    %48 = vector.load %arg12[%c0_29, %c0_30, %c0_31, %c0_32] : memref<1x4x8x8xbf16, #tpu.memory_space<vmem>>, vector<1x1x8x8xbf16>
    %49 = vector.shape_cast %48 : vector<1x1x8x8xbf16> to vector<8x8xbf16>
    %50 = vector.shape_cast %47 : vector<8x8xbf16> to vector<1x1x8x8xbf16>
    tpu.vector_store %arg12[%c0_29, %c0_30, %c0_31, %c0_32], %50 {strides = array<i32>} : memref<1x4x8x8xbf16, #tpu.memory_space<vmem>>, vector<1x1x8x8xbf16>,
    %c0_33 = arith.constant 0 : index
    %c0_34 = arith.constant 0 : index
    %c0_35 = arith.constant 0 : index
    %51 = vector.load %arg9[%c0_33, %c0_34, %c0_35] : memref<4x32x8xbf16, #tpu.memory_space<vmem>>, vector<1x32x8xbf16>
    %52 = vector.shape_cast %51 : vector<1x32x8xbf16> to vector<32x8xbf16>
    %cst_36 = arith.constant dense<0.000000e+00> : vector<8x8xf32>
    %53 = tpu.matmul %26, %52, %cst_36 {dimension_numbers = #tpu.dot_dimension_numbers<[1], [0], [0], [1], [0, 0, 1, 1], [], []>} : vector<8x32xbf16>, vector<32x8xbf16>, vector<8x8xf32> -> vector<8x8xf32>
    %c0_37 = arith.constant 0 : index
    %c0_38 = arith.constant 0 : index
    %c0_39 = arith.constant 0 : index
    %54 = vector.load %arg10[%c0_37, %c0_38, %c0_39] : memref<4x1x8xf32, #tpu.memory_space<vmem>>, vector<1x1x8xf32>
    %55 = vector.shape_cast %54 : vector<1x1x8xf32> to vector<1x8xf32>
    %56 = vector.broadcast %55 : vector<1x8xf32> to vector<8x8xf32>
    %57 = arith.addf %53, %56 : vector<8x8xf32>
    %58 = arith.truncf %57 : vector<8x8xf32> to vector<8x8xbf16>
    %c0_40 = arith.constant 0 : index
    %c0_41 = arith.constant 0 : index
    %c0_42 = arith.constant 0 : index
    %c0_43 = arith.constant 0 : index
    %59 = vector.load %arg13[%c0_40, %c0_41, %c0_42, %c0_43] : memref<1x4x8x8xbf16, #tpu.memory_space<vmem>>, vector<1x1x8x8xbf16>
    %60 = vector.shape_cast %59 : vector<1x1x8x8xbf16> to vector<8x8xbf16>
    %61 = vector.shape_cast %58 : vector<8x8xbf16> to vector<1x1x8x8xbf16>
    tpu.vector_store %arg13[%c0_40, %c0_41, %c0_42, %c0_43], %61 {strides = array<i32>} : memref<1x4x8x8xbf16, #tpu.memory_space<vmem>>, vector<1x1x8x8xbf16>,
    %c1 = arith.constant 1 : index
    %c0_44 = arith.constant 0 : index
    %c0_45 = arith.constant 0 : index
    %62 = vector.load %arg5[%c1, %c0_44, %c0_45] : memref<4x32x8xbf16, #tpu.memory_space<vmem>>, vector<1x32x8xbf16>
    %63 = vector.shape_cast %62 : vector<1x32x8xbf16> to vector<32x8xbf16>
    %cst_46 = arith.constant dense<0.000000e+00> : vector<8x8xf32>
    %64 = tpu.matmul %26, %63, %cst_46 {dimension_numbers = #tpu.dot_dimension_numbers<[1], [0], [0], [1], [0, 0, 1, 1], [], []>} : vector<8x32xbf16>, vector<32x8xbf16>, vector<8x8xf32> -> vector<8x8xf32>
    %c1_47 = arith.constant 1 : index
    %c0_48 = arith.constant 0 : index
    %c0_49 = arith.constant 0 : index
    %65 = vector.load %arg6[%c1_47, %c0_48, %c0_49] : memref<4x1x8xf32, #tpu.memory_space<vmem>>, vector<1x1x8xf32>
    %66 = vector.shape_cast %65 : vector<1x1x8xf32> to vector<1x8xf32>
    %67 = vector.broadcast %66 : vector<1x8xf32> to vector<8x8xf32>
    %68 = arith.addf %64, %67 : vector<8x8xf32>
    %cst_50 = arith.constant 0.353553385 : f32
    %69 = vector.broadcast %cst_50 : f32 to vector<8x8xf32>
    %70 = arith.mulf %68, %69 : vector<8x8xf32>
    %71 = arith.truncf %70 : vector<8x8xf32> to vector<8x8xbf16>
    %c0_51 = arith.constant 0 : index
    %c1_52 = arith.constant 1 : index
    %c0_53 = arith.constant 0 : index
    %c0_54 = arith.constant 0 : index
    %72 = vector.load %arg11[%c0_51, %c1_52, %c0_53, %c0_54] : memref<1x4x8x8xbf16, #tpu.memory_space<vmem>>, vector<1x1x8x8xbf16>
    %73 = vector.shape_cast %72 : vector<1x1x8x8xbf16> to vector<8x8xbf16>
    %74 = vector.shape_cast %71 : vector<8x8xbf16> to vector<1x1x8x8xbf16>
    tpu.vector_store %arg11[%c0_51, %c1_52, %c0_53, %c0_54], %74 {strides = array<i32>} : memref<1x4x8x8xbf16, #tpu.memory_space<vmem>>, vector<1x1x8x8xbf16>,
    %c1_55 = arith.constant 1 : index
    %c0_56 = arith.constant 0 : index
    %c0_57 = arith.constant 0 : index
    %75 = vector.load %arg7[%c1_55, %c0_56, %c0_57] : memref<4x32x8xbf16, #tpu.memory_space<vmem>>, vector<1x32x8xbf16>
    %76 = vector.shape_cast %75 : vector<1x32x8xbf16> to vector<32x8xbf16>
    %cst_58 = arith.constant dense<0.000000e+00> : vector<8x8xf32>
    %77 = tpu.matmul %26, %76, %cst_58 {dimension_numbers = #tpu.dot_dimension_numbers<[1], [0], [0], [1], [0, 0, 1, 1], [], []>} : vector<8x32xbf16>, vector<32x8xbf16>, vector<8x8xf32> -> vector<8x8xf32>
    %c1_59 = arith.constant 1 : index
    %c0_60 = arith.constant 0 : index
    %c0_61 = arith.constant 0 : index
    %78 = vector.load %arg8[%c1_59, %c0_60, %c0_61] : memref<4x1x8xf32, #tpu.memory_space<vmem>>, vector<1x1x8xf32>
    %79 = vector.shape_cast %78 : vector<1x1x8xf32> to vector<1x8xf32>
    %80 = vector.broadcast %79 : vector<1x8xf32> to vector<8x8xf32>
    %81 = arith.addf %77, %80 : vector<8x8xf32>
    %82 = arith.truncf %81 : vector<8x8xf32> to vector<8x8xbf16>
    %c0_62 = arith.constant 0 : index
    %c1_63 = arith.constant 1 : index
    %c0_64 = arith.constant 0 : index
    %c0_65 = arith.constant 0 : index
    %83 = vector.load %arg12[%c0_62, %c1_63, %c0_64, %c0_65] : memref<1x4x8x8xbf16, #tpu.memory_space<vmem>>, vector<1x1x8x8xbf16>
    %84 = vector.shape_cast %83 : vector<1x1x8x8xbf16> to vector<8x8xbf16>
    %85 = vector.shape_cast %82 : vector<8x8xbf16> to vector<1x1x8x8xbf16>
    tpu.vector_store %arg12[%c0_62, %c1_63, %c0_64, %c0_65], %85 {strides = array<i32>} : memref<1x4x8x8xbf16, #tpu.memory_space<vmem>>, vector<1x1x8x8xbf16>,
    %c1_66 = arith.constant 1 : index
    %c0_67 = arith.constant 0 : index
    %c0_68 = arith.constant 0 : index
    %86 = vector.load %arg9[%c1_66, %c0_67, %c0_68] : memref<4x32x8xbf16, #tpu.memory_space<vmem>>, vector<1x32x8xbf16>
    %87 = vector.shape_cast %86 : vector<1x32x8xbf16> to vector<32x8xbf16>
    %cst_69 = arith.constant dense<0.000000e+00> : vector<8x8xf32>
    %88 = tpu.matmul %26, %87, %cst_69 {dimension_numbers = #tpu.dot_dimension_numbers<[1], [0], [0], [1], [0, 0, 1, 1], [], []>} : vector<8x32xbf16>, vector<32x8xbf16>, vector<8x8xf32> -> vector<8x8xf32>
    %c1_70 = arith.constant 1 : index
    %c0_71 = arith.constant 0 : index
    %c0_72 = arith.constant 0 : index
    %89 = vector.load %arg10[%c1_70, %c0_71, %c0_72] : memref<4x1x8xf32, #tpu.memory_space<vmem>>, vector<1x1x8xf32>
    %90 = vector.shape_cast %89 : vector<1x1x8xf32> to vector<1x8xf32>
    %91 = vector.broadcast %90 : vector<1x8xf32> to vector<8x8xf32>
    %92 = arith.addf %88, %91 : vector<8x8xf32>
    %93 = arith.truncf %92 : vector<8x8xf32> to vector<8x8xbf16>
    %c0_73 = arith.constant 0 : index
    %c1_74 = arith.constant 1 : index
    %c0_75 = arith.constant 0 : index
    %c0_76 = arith.constant 0 : index
    %94 = vector.load %arg13[%c0_73, %c1_74, %c0_75, %c0_76] : memref<1x4x8x8xbf16, #tpu.memory_space<vmem>>, vector<1x1x8x8xbf16>
    %95 = vector.shape_cast %94 : vector<1x1x8x8xbf16> to vector<8x8xbf16>
    %96 = vector.shape_cast %93 : vector<8x8xbf16> to vector<1x1x8x8xbf16>
    tpu.vector_store %arg13[%c0_73, %c1_74, %c0_75, %c0_76], %96 {strides = array<i32>} : memref<1x4x8x8xbf16, #tpu.memory_space<vmem>>, vector<1x1x8x8xbf16>,
    %c2 = arith.constant 2 : index
    %c0_77 = arith.constant 0 : index
    %c0_78 = arith.constant 0 : index
    %97 = vector.load %arg5[%c2, %c0_77, %c0_78] : memref<4x32x8xbf16, #tpu.memory_space<vmem>>, vector<1x32x8xbf16>
    %98 = vector.shape_cast %97 : vector<1x32x8xbf16> to vector<32x8xbf16>
    %cst_79 = arith.constant dense<0.000000e+00> : vector<8x8xf32>
    %99 = tpu.matmul %26, %98, %cst_79 {dimension_numbers = #tpu.dot_dimension_numbers<[1], [0], [0], [1], [0, 0, 1, 1], [], []>} : vector<8x32xbf16>, vector<32x8xbf16>, vector<8x8xf32> -> vector<8x8xf32>
    %c2_80 = arith.constant 2 : index
    %c0_81 = arith.constant 0 : index
    %c0_82 = arith.constant 0 : index
    %100 = vector.load %arg6[%c2_80, %c0_81, %c0_82] : memref<4x1x8xf32, #tpu.memory_space<vmem>>, vector<1x1x8xf32>
    %101 = vector.shape_cast %100 : vector<1x1x8xf32> to vector<1x8xf32>
    %102 = vector.broadcast %101 : vector<1x8xf32> to vector<8x8xf32>
    %103 = arith.addf %99, %102 : vector<8x8xf32>
    %cst_83 = arith.constant 0.353553385 : f32
    %104 = vector.broadcast %cst_83 : f32 to vector<8x8xf32>
    %105 = arith.mulf %103, %104 : vector<8x8xf32>
    %106 = arith.truncf %105 : vector<8x8xf32> to vector<8x8xbf16>
    %c0_84 = arith.constant 0 : index
    %c2_85 = arith.constant 2 : index
    %c0_86 = arith.constant 0 : index
    %c0_87 = arith.constant 0 : index
    %107 = vector.load %arg11[%c0_84, %c2_85, %c0_86, %c0_87] : memref<1x4x8x8xbf16, #tpu.memory_space<vmem>>, vector<1x1x8x8xbf16>
    %108 = vector.shape_cast %107 : vector<1x1x8x8xbf16> to vector<8x8xbf16>
    %109 = vector.shape_cast %106 : vector<8x8xbf16> to vector<1x1x8x8xbf16>
    tpu.vector_store %arg11[%c0_84, %c2_85, %c0_86, %c0_87], %109 {strides = array<i32>} : memref<1x4x8x8xbf16, #tpu.memory_space<vmem>>, vector<1x1x8x8xbf16>,
    %c2_88 = arith.constant 2 : index
    %c0_89 = arith.constant 0 : index
    %c0_90 = arith.constant 0 : index
    %110 = vector.load %arg7[%c2_88, %c0_89, %c0_90] : memref<4x32x8xbf16, #tpu.memory_space<vmem>>, vector<1x32x8xbf16>
    %111 = vector.shape_cast %110 : vector<1x32x8xbf16> to vector<32x8xbf16>
    %cst_91 = arith.constant dense<0.000000e+00> : vector<8x8xf32>
    %112 = tpu.matmul %26, %111, %cst_91 {dimension_numbers = #tpu.dot_dimension_numbers<[1], [0], [0], [1], [0, 0, 1, 1], [], []>} : vector<8x32xbf16>, vector<32x8xbf16>, vector<8x8xf32> -> vector<8x8xf32>
    %c2_92 = arith.constant 2 : index
    %c0_93 = arith.constant 0 : index
    %c0_94 = arith.constant 0 : index
    %113 = vector.load %arg8[%c2_92, %c0_93, %c0_94] : memref<4x1x8xf32, #tpu.memory_space<vmem>>, vector<1x1x8xf32>
    %114 = vector.shape_cast %113 : vector<1x1x8xf32> to vector<1x8xf32>
    %115 = vector.broadcast %114 : vector<1x8xf32> to vector<8x8xf32>
    %116 = arith.addf %112, %115 : vector<8x8xf32>
    %117 = arith.truncf %116 : vector<8x8xf32> to vector<8x8xbf16>
    %c0_95 = arith.constant 0 : index
    %c2_96 = arith.constant 2 : index
    %c0_97 = arith.constant 0 : index
    %c0_98 = arith.constant 0 : index
    %118 = vector.load %arg12[%c0_95, %c2_96, %c0_97, %c0_98] : memref<1x4x8x8xbf16, #tpu.memory_space<vmem>>, vector<1x1x8x8xbf16>
    %119 = vector.shape_cast %118 : vector<1x1x8x8xbf16> to vector<8x8xbf16>
    %120 = vector.shape_cast %117 : vector<8x8xbf16> to vector<1x1x8x8xbf16>
    tpu.vector_store %arg12[%c0_95, %c2_96, %c0_97, %c0_98], %120 {strides = array<i32>} : memref<1x4x8x8xbf16, #tpu.memory_space<vmem>>, vector<1x1x8x8xbf16>,
    %c2_99 = arith.constant 2 : index
    %c0_100 = arith.constant 0 : index
    %c0_101 = arith.constant 0 : index
    %121 = vector.load %arg9[%c2_99, %c0_100, %c0_101] : memref<4x32x8xbf16, #tpu.memory_space<vmem>>, vector<1x32x8xbf16>
    %122 = vector.shape_cast %121 : vector<1x32x8xbf16> to vector<32x8xbf16>
    %cst_102 = arith.constant dense<0.000000e+00> : vector<8x8xf32>
    %123 = tpu.matmul %26, %122, %cst_102 {dimension_numbers = #tpu.dot_dimension_numbers<[1], [0], [0], [1], [0, 0, 1, 1], [], []>} : vector<8x32xbf16>, vector<32x8xbf16>, vector<8x8xf32> -> vector<8x8xf32>
    %c2_103 = arith.constant 2 : index
    %c0_104 = arith.constant 0 : index
    %c0_105 = arith.constant 0 : index
    %124 = vector.load %arg10[%c2_103, %c0_104, %c0_105] : memref<4x1x8xf32, #tpu.memory_space<vmem>>, vector<1x1x8xf32>
    %125 = vector.shape_cast %124 : vector<1x1x8xf32> to vector<1x8xf32>
    %126 = vector.broadcast %125 : vector<1x8xf32> to vector<8x8xf32>
    %127 = arith.addf %123, %126 : vector<8x8xf32>
    %128 = arith.truncf %127 : vector<8x8xf32> to vector<8x8xbf16>
    %c0_106 = arith.constant 0 : index
    %c2_107 = arith.constant 2 : index
    %c0_108 = arith.constant 0 : index
    %c0_109 = arith.constant 0 : index
    %129 = vector.load %arg13[%c0_106, %c2_107, %c0_108, %c0_109] : memref<1x4x8x8xbf16, #tpu.memory_space<vmem>>, vector<1x1x8x8xbf16>
    %130 = vector.shape_cast %129 : vector<1x1x8x8xbf16> to vector<8x8xbf16>
    %131 = vector.shape_cast %128 : vector<8x8xbf16> to vector<1x1x8x8xbf16>
    tpu.vector_store %arg13[%c0_106, %c2_107, %c0_108, %c0_109], %131 {strides = array<i32>} : memref<1x4x8x8xbf16, #tpu.memory_space<vmem>>, vector<1x1x8x8xbf16>,
    %c3 = arith.constant 3 : index
    %c0_110 = arith.constant 0 : index
    %c0_111 = arith.constant 0 : index
    %132 = vector.load %arg5[%c3, %c0_110, %c0_111] : memref<4x32x8xbf16, #tpu.memory_space<vmem>>, vector<1x32x8xbf16>
    %133 = vector.shape_cast %132 : vector<1x32x8xbf16> to vector<32x8xbf16>
    %cst_112 = arith.constant dense<0.000000e+00> : vector<8x8xf32>
    %134 = tpu.matmul %26, %133, %cst_112 {dimension_numbers = #tpu.dot_dimension_numbers<[1], [0], [0], [1], [0, 0, 1, 1], [], []>} : vector<8x32xbf16>, vector<32x8xbf16>, vector<8x8xf32> -> vector<8x8xf32>
    %c3_113 = arith.constant 3 : index
    %c0_114 = arith.constant 0 : index
    %c0_115 = arith.constant 0 : index
    %135 = vector.load %arg6[%c3_113, %c0_114, %c0_115] : memref<4x1x8xf32, #tpu.memory_space<vmem>>, vector<1x1x8xf32>
    %136 = vector.shape_cast %135 : vector<1x1x8xf32> to vector<1x8xf32>
    %137 = vector.broadcast %136 : vector<1x8xf32> to vector<8x8xf32>
    %138 = arith.addf %134, %137 : vector<8x8xf32>
    %cst_116 = arith.constant 0.353553385 : f32
    %139 = vector.broadcast %cst_116 : f32 to vector<8x8xf32>
    %140 = arith.mulf %138, %139 : vector<8x8xf32>
    %141 = arith.truncf %140 : vector<8x8xf32> to vector<8x8xbf16>
    %c0_117 = arith.constant 0 : index
    %c3_118 = arith.constant 3 : index
    %c0_119 = arith.constant 0 : index
    %c0_120 = arith.constant 0 : index
    %142 = vector.load %arg11[%c0_117, %c3_118, %c0_119, %c0_120] : memref<1x4x8x8xbf16, #tpu.memory_space<vmem>>, vector<1x1x8x8xbf16>
    %143 = vector.shape_cast %142 : vector<1x1x8x8xbf16> to vector<8x8xbf16>
    %144 = vector.shape_cast %141 : vector<8x8xbf16> to vector<1x1x8x8xbf16>
    tpu.vector_store %arg11[%c0_117, %c3_118, %c0_119, %c0_120], %144 {strides = array<i32>} : memref<1x4x8x8xbf16, #tpu.memory_space<vmem>>, vector<1x1x8x8xbf16>,
    %c3_121 = arith.constant 3 : index
    %c0_122 = arith.constant 0 : index
    %c0_123 = arith.constant 0 : index
    %145 = vector.load %arg7[%c3_121, %c0_122, %c0_123] : memref<4x32x8xbf16, #tpu.memory_space<vmem>>, vector<1x32x8xbf16>
    %146 = vector.shape_cast %145 : vector<1x32x8xbf16> to vector<32x8xbf16>
    %cst_124 = arith.constant dense<0.000000e+00> : vector<8x8xf32>
    %147 = tpu.matmul %26, %146, %cst_124 {dimension_numbers = #tpu.dot_dimension_numbers<[1], [0], [0], [1], [0, 0, 1, 1], [], []>} : vector<8x32xbf16>, vector<32x8xbf16>, vector<8x8xf32> -> vector<8x8xf32>
    %c3_125 = arith.constant 3 : index
    %c0_126 = arith.constant 0 : index
    %c0_127 = arith.constant 0 : index
    %148 = vector.load %arg8[%c3_125, %c0_126, %c0_127] : memref<4x1x8xf32, #tpu.memory_space<vmem>>, vector<1x1x8xf32>
    %149 = vector.shape_cast %148 : vector<1x1x8xf32> to vector<1x8xf32>
    %150 = vector.broadcast %149 : vector<1x8xf32> to vector<8x8xf32>
    %151 = arith.addf %147, %150 : vector<8x8xf32>
    %152 = arith.truncf %151 : vector<8x8xf32> to vector<8x8xbf16>
    %c0_128 = arith.constant 0 : index
    %c3_129 = arith.constant 3 : index
    %c0_130 = arith.constant 0 : index
    %c0_131 = arith.constant 0 : index
    %153 = vector.load %arg12[%c0_128, %c3_129, %c0_130, %c0_131] : memref<1x4x8x8xbf16, #tpu.memory_space<vmem>>, vector<1x1x8x8xbf16>
    %154 = vector.shape_cast %153 : vector<1x1x8x8xbf16> to vector<8x8xbf16>
    %155 = vector.shape_cast %152 : vector<8x8xbf16> to vector<1x1x8x8xbf16>
    tpu.vector_store %arg12[%c0_128, %c3_129, %c0_130, %c0_131], %155 {strides = array<i32>} : memref<1x4x8x8xbf16, #tpu.memory_space<vmem>>, vector<1x1x8x8xbf16>,
    %c3_132 = arith.constant 3 : index
    %c0_133 = arith.constant 0 : index
    %c0_134 = arith.constant 0 : index
    %156 = vector.load %arg9[%c3_132, %c0_133, %c0_134] : memref<4x32x8xbf16, #tpu.memory_space<vmem>>, vector<1x32x8xbf16>
    %157 = vector.shape_cast %156 : vector<1x32x8xbf16> to vector<32x8xbf16>
    %cst_135 = arith.constant dense<0.000000e+00> : vector<8x8xf32>
    %158 = tpu.matmul %26, %157, %cst_135 {dimension_numbers = #tpu.dot_dimension_numbers<[1], [0], [0], [1], [0, 0, 1, 1], [], []>} : vector<8x32xbf16>, vector<32x8xbf16>, vector<8x8xf32> -> vector<8x8xf32>
    %c3_136 = arith.constant 3 : index
    %c0_137 = arith.constant 0 : index
    %c0_138 = arith.constant 0 : index
    %159 = vector.load %arg10[%c3_136, %c0_137, %c0_138] : memref<4x1x8xf32, #tpu.memory_space<vmem>>, vector<1x1x8xf32>
    %160 = vector.shape_cast %159 : vector<1x1x8xf32> to vector<1x8xf32>
    %161 = vector.broadcast %160 : vector<1x8xf32> to vector<8x8xf32>
    %162 = arith.addf %158, %161 : vector<8x8xf32>
    %163 = arith.truncf %162 : vector<8x8xf32> to vector<8x8xbf16>
    %c0_139 = arith.constant 0 : index
    %c3_140 = arith.constant 3 : index
    %c0_141 = arith.constant 0 : index
    %c0_142 = arith.constant 0 : index
    %164 = vector.load %arg13[%c0_139, %c3_140, %c0_141, %c0_142] : memref<1x4x8x8xbf16, #tpu.memory_space<vmem>>, vector<1x1x8x8xbf16>
    %165 = vector.shape_cast %164 : vector<1x1x8x8xbf16> to vector<8x8xbf16>
    %166 = vector.shape_cast %163 : vector<8x8xbf16> to vector<1x1x8x8xbf16>
    tpu.vector_store %arg13[%c0_139, %c3_140, %c0_141, %c0_142], %166 {strides = array<i32>} : memref<1x4x8x8xbf16, #tpu.memory_space<vmem>>, vector<1x1x8x8xbf16>,
    return
  }
  func.func @transform_0(%arg0: i32, %arg1: i32) -> (i32, i32, i32) {
    %c0_i32 = arith.constant 0 : i32
    %c0_i32_0 = arith.constant 0 : i32
    return %arg0, %arg1, %c0_i32 : i32, i32, i32
  }
  func.func @transform_1(%arg0: i32, %arg1: i32) -> (i32, i32) {
    %c0_i32 = arith.constant 0 : i32
    %c0_i32_0 = arith.constant 0 : i32
    %c0_i32_1 = arith.constant 0 : i32
    return %c0_i32, %c0_i32_0 : i32, i32
  }
  func.func @transform_2(%arg0: i32, %arg1: i32) -> (i32, i32) {
    %c0_i32 = arith.constant 0 : i32
    %c0_i32_0 = arith.constant 0 : i32
    %c0_i32_1 = arith.constant 0 : i32
    return %c0_i32, %c0_i32_0 : i32, i32
  }
  func.func @transform_3(%arg0: i32, %arg1: i32) -> (i32, i32, i32) {
    %c0_i32 = arith.constant 0 : i32
    %c0_i32_0 = arith.constant 0 : i32
    %c0_i32_1 = arith.constant 0 : i32
    %c0_i32_2 = arith.constant 0 : i32
    return %c0_i32, %c0_i32_0, %c0_i32_1 : i32, i32, i32
  }
  func.func @transform_4(%arg0: i32, %arg1: i32) -> (i32, i32, i32) {
    %c0_i32 = arith.constant 0 : i32
    %c0_i32_0 = arith.constant 0 : i32
    %c0_i32_1 = arith.constant 0 : i32
    %c0_i32_2 = arith.constant 0 : i32
    return %c0_i32, %c0_i32_0, %c0_i32_1 : i32, i32, i32
  }
  func.func @transform_5(%arg0: i32, %arg1: i32) -> (i32, i32, i32) {
    %c0_i32 = arith.constant 0 : i32
    %c0_i32_0 = arith.constant 0 : i32
    %c0_i32_1 = arith.constant 0 : i32
    %c0_i32_2 = arith.constant 0 : i32
    return %c0_i32, %c0_i32_0, %c0_i32_1 : i32, i32, i32
  }
  func.func @transform_6(%arg0: i32, %arg1: i32) -> (i32, i32, i32) {
    %c0_i32 = arith.constant 0 : i32
    %c0_i32_0 = arith.constant 0 : i32
    %c0_i32_1 = arith.constant 0 : i32
    %c0_i32_2 = arith.constant 0 : i32
    return %c0_i32, %c0_i32_0, %c0_i32_1 : i32, i32, i32
  }
  func.func @transform_7(%arg0: i32, %arg1: i32) -> (i32, i32, i32) {
    %c0_i32 = arith.constant 0 : i32
    %c0_i32_0 = arith.constant 0 : i32
    %c0_i32_1 = arith.constant 0 : i32
    %c0_i32_2 = arith.constant 0 : i32
    return %c0_i32, %c0_i32_0, %c0_i32_1 : i32, i32, i32
  }
  func.func @transform_8(%arg0: i32, %arg1: i32) -> (i32, i32, i32) {
    %c0_i32 = arith.constant 0 : i32
    %c0_i32_0 = arith.constant 0 : i32
    %c0_i32_1 = arith.constant 0 : i32
    %c0_i32_2 = arith.constant 0 : i32
    return %c0_i32, %c0_i32_0, %c0_i32_1 : i32, i32, i32
  }
  func.func @transform_9(%arg0: i32, %arg1: i32) -> (i32, i32, i32, i32) {
    %c0_i32 = arith.constant 0 : i32
    %c0_i32_0 = arith.constant 0 : i32
    %c0_i32_1 = arith.constant 0 : i32
    return %arg0, %c0_i32, %arg1, %c0_i32_0 : i32, i32, i32, i32
  }
  func.func @transform_10(%arg0: i32, %arg1: i32) -> (i32, i32, i32, i32) {
    %c0_i32 = arith.constant 0 : i32
    %c0_i32_0 = arith.constant 0 : i32
    %c0_i32_1 = arith.constant 0 : i32
    return %arg0, %c0_i32, %arg1, %c0_i32_0 : i32, i32, i32, i32
  }
  func.func @transform_11(%arg0: i32, %arg1: i32) -> (i32, i32, i32, i32) {
    %c0_i32 = arith.constant 0 : i32
    %c0_i32_0 = arith.constant 0 : i32
    %c0_i32_1 = arith.constant 0 : i32
    return %arg0, %c0_i32, %arg1, %c0_i32_0 : i32, i32, i32, i32
  }
}

module attributes {stable_mosaic.version = 11 : i64} {
  func.func @_qkv_kernel(%arg0: i32, %arg1: i32, %arg2: memref<1x8x32xf32, #tpu.memory_space<vmem>>, %arg3: memref<1x32xf32, #tpu.memory_space<vmem>>, %arg4: memref<1x32xf32, #tpu.memory_space<vmem>>, %arg5: memref<4x32x8xbf16, #tpu.memory_space<vmem>>, %arg6: memref<4x1x8xf32, #tpu.memory_space<vmem>>, %arg7: memref<4x32x8xbf16, #tpu.memory_space<vmem>>, %arg8: memref<4x1x8xf32, #tpu.memory_space<vmem>>, %arg9: memref<4x32x8xbf16, #tpu.memory_space<vmem>>, %arg10: memref<4x1x8xf32, #tpu.memory_space<vmem>>, %arg11: memref<1x4x8x8xbf16, #tpu.memory_space<vmem>>, %arg12: memref<1x4x8x8xbf16, #tpu.memory_space<vmem>>, %arg13: memref<1x4x8x8xbf16, #tpu.memory_space<vmem>>) attributes {dimension_semantics = [#tpu.dimension_semantics<parallel>, #tpu.dimension_semantics<parallel>], iteration_bounds = array<i64: 2, 1>, scalar_prefetch = 0 : i64, scratch_operands = 0 : i64, tpu.core_type = #tpu.core_type<tc>, window_params = [{transform_indices = @transform_0, window_bounds = array<i64: 1, 8, 32>}, {pipeline_mode = #tpu.pipeline_mode<synchronous>, transform_indices = @transform_1, window_bounds = array<i64: 1, 32>}, {pipeline_mode = #tpu.pipeline_mode<synchronous>, transform_indices = @transform_2, window_bounds = array<i64: 1, 32>}, {pipeline_mode = #tpu.pipeline_mode<synchronous>, transform_indices = @transform_3, window_bounds = array<i64: 4, 32, 8>}, {pipeline_mode = #tpu.pipeline_mode<synchronous>, transform_indices = @transform_4, window_bounds = array<i64: 4, 1, 8>}, {pipeline_mode = #tpu.pipeline_mode<synchronous>, transform_indices = @transform_5, window_bounds = array<i64: 4, 32, 8>}, {pipeline_mode = #tpu.pipeline_mode<synchronous>, transform_indices = @transform_6, window_bounds = array<i64: 4, 1, 8>}, {pipeline_mode = #tpu.pipeline_mode<synchronous>, transform_indices = @transform_7, window_bounds = array<i64: 4, 32, 8>}, {pipeline_mode = #tpu.pipeline_mode<synchronous>, transform_indices = @transform_8, window_bounds = array<i64: 4, 1, 8>}, {transform_indices = @transform_9, window_bounds = array<i64: 1, 4, 8, 8>}, {transform_indices = @transform_10, window_bounds = array<i64: 1, 4, 8, 8>}, {transform_indices = @transform_11, window_bounds = array<i64: 1, 4, 8, 8>}]} {
    %c0 = arith.constant 0 : index
    %c0_0 = arith.constant 0 : index
    %c0_1 = arith.constant 0 : index
    %0 = vector.load %arg2[%c0, %c0_0, %c0_1] : memref<1x8x32xf32, #tpu.memory_space<vmem>>, vector<1x8x32xf32>
    %1 = vector.shape_cast %0 : vector<1x8x32xf32> to vector<8x32xf32>
    %c0_2 = arith.constant 0 : index
    %c0_3 = arith.constant 0 : index
    %2 = vector.load %arg3[%c0_2, %c0_3] : memref<1x32xf32, #tpu.memory_space<vmem>>, vector<1x32xf32>
    %c0_4 = arith.constant 0 : index
    %c0_5 = arith.constant 0 : index
    %3 = vector.load %arg4[%c0_4, %c0_5] : memref<1x32xf32, #tpu.memory_space<vmem>>, vector<1x32xf32>
    %cst = arith.constant dense<0.000000e+00> : vector<8xf32>
    %4 = vector.multi_reduction <add>, %1, %cst [1] : vector<8x32xf32> to vector<8xf32>
    %5 = vector.shape_cast %4 : vector<8xf32> to vector<8x1xf32>
    %cst_6 = arith.constant 3.200000e+01 : f32
    %6 = vector.broadcast %cst_6 : f32 to vector<8x1xf32>
    %7 = arith.divf %5, %6 : vector<8x1xf32>
    %8 = vector.broadcast %7 : vector<8x1xf32> to vector<8x32xf32>
    %9 = arith.subf %1, %8 : vector<8x32xf32>
    %10 = arith.mulf %9, %9 : vector<8x32xf32>
    %cst_7 = arith.constant dense<0.000000e+00> : vector<8xf32>
    %11 = vector.multi_reduction <add>, %10, %cst_7 [1] : vector<8x32xf32> to vector<8xf32>
    %12 = vector.shape_cast %11 : vector<8xf32> to vector<8x1xf32>
    %cst_8 = arith.constant 3.200000e+01 : f32
    %13 = vector.broadcast %cst_8 : f32 to vector<8x1xf32>
    %14 = arith.divf %12, %13 : vector<8x1xf32>
    %15 = vector.broadcast %7 : vector<8x1xf32> to vector<8x32xf32>
    %16 = arith.subf %1, %15 : vector<8x32xf32>
    %cst_9 = arith.constant 9.99999974E-6 : f32
    %17 = vector.broadcast %cst_9 : f32 to vector<8x1xf32>
    %18 = arith.addf %14, %17 : vector<8x1xf32>
    %19 = math.rsqrt %18 : vector<8x1xf32>
    %20 = vector.broadcast %19 : vector<8x1xf32> to vector<8x32xf32>
    %21 = arith.mulf %16, %20 : vector<8x32xf32>
    %22 = vector.broadcast %2 : vector<1x32xf32> to vector<8x32xf32>
    %23 = arith.mulf %21, %22 : vector<8x32xf32>
    %24 = vector.broadcast %3 : vector<1x32xf32> to vector<8x32xf32>
    %25 = arith.addf %23, %24 : vector<8x32xf32>
    %26 = arith.truncf %25 : vector<8x32xf32> to vector<8x32xbf16>
    %c0_10 = arith.constant 0 : index
    %c0_11 = arith.constant 0 : index
    %c0_12 = arith.constant 0 : index
    %27 = vector.load %arg5[%c0_10, %c0_11, %c0_12] : memref<4x32x8xbf16, #tpu.memory_space<vmem>>, vector<1x32x8xbf16>
    %28 = vector.shape_cast %27 : vector<1x32x8xbf16> to vector<32x8xbf16>
    %cst_13 = arith.constant dense<0.000000e+00> : vector<8x8xf32>
    %29 = tpu.matmul %26, %28, %cst_13 {dimension_numbers = #tpu.dot_dimension_numbers<[1], [0], [0], [1], [0, 0, 1, 1], [], []>} : vector<8x32xbf16>, vector<32x8xbf16>, vector<8x8xf32> -> vector<8x8xf32>
    %c0_14 = arith.constant 0 : index
    %c0_15 = arith.constant 0 : index
    %c0_16 = arith.constant 0 : index
    %30 = vector.load %arg6[%c0_14, %c0_15, %c0_16] : memref<4x1x8xf32, #tpu.memory_space<vmem>>, vector<1x1x8xf32>
    %31 = vector.shape_cast %30 : vector<1x1x8xf32> to vector<1x8xf32>
    %32 = vector.broadcast %31 : vector<1x8xf32> to vector<8x8xf32>
    %33 = arith.addf %29, %32 : vector<8x8xf32>
    %cst_17 = arith.constant 0.353553385 : f32
    %34 = vector.broadcast %cst_17 : f32 to vector<8x8xf32>
    %35 = arith.mulf %33, %34 : vector<8x8xf32>
    %36 = arith.truncf %35 : vector<8x8xf32> to vector<8x8xbf16>
    %c0_18 = arith.constant 0 : index
    %c0_19 = arith.constant 0 : index
    %c0_20 = arith.constant 0 : index
    %c0_21 = arith.constant 0 : index
    %37 = vector.load %arg11[%c0_18, %c0_19, %c0_20, %c0_21] : memref<1x4x8x8xbf16, #tpu.memory_space<vmem>>, vector<1x1x8x8xbf16>
    %38 = vector.shape_cast %37 : vector<1x1x8x8xbf16> to vector<8x8xbf16>
    %39 = vector.shape_cast %36 : vector<8x8xbf16> to vector<1x1x8x8xbf16>
    tpu.vector_store %arg11[%c0_18, %c0_19, %c0_20, %c0_21], %39 {strides = array<i32>} : memref<1x4x8x8xbf16, #tpu.memory_space<vmem>>, vector<1x1x8x8xbf16>,
    %c0_22 = arith.constant 0 : index
    %c0_23 = arith.constant 0 : index
    %c0_24 = arith.constant 0 : index
    %40 = vector.load %arg7[%c0_22, %c0_23, %c0_24] : memref<4x32x8xbf16, #tpu.memory_space<vmem>>, vector<1x32x8xbf16>
    %41 = vector.shape_cast %40 : vector<1x32x8xbf16> to vector<32x8xbf16>
    %cst_25 = arith.constant dense<0.000000e+00> : vector<8x8xf32>
    %42 = tpu.matmul %26, %41, %cst_25 {dimension_numbers = #tpu.dot_dimension_numbers<[1], [0], [0], [1], [0, 0, 1, 1], [], []>} : vector<8x32xbf16>, vector<32x8xbf16>, vector<8x8xf32> -> vector<8x8xf32>
    %c0_26 = arith.constant 0 : index
    %c0_27 = arith.constant 0 : index
    %c0_28 = arith.constant 0 : index
    %43 = vector.load %arg8[%c0_26, %c0_27, %c0_28] : memref<4x1x8xf32, #tpu.memory_space<vmem>>, vector<1x1x8xf32>
    %44 = vector.shape_cast %43 : vector<1x1x8xf32> to vector<1x8xf32>
    %45 = vector.broadcast %44 : vector<1x8xf32> to vector<8x8xf32>
    %46 = arith.addf %42, %45 : vector<8x8xf32>
    %47 = arith.truncf %46 : vector<8x8xf32> to vector<8x8xbf16>
    %c0_29 = arith.constant 0 : index
    %c0_30 = arith.constant 0 : index
    %c0_31 = arith.constant 0 : index
    %c0_32 = arith.constant 0 : index
    %48 = vector.load %arg12[%c0_29, %c0_30, %c0_31, %c0_32] : memref<1x4x8x8xbf16, #tpu.memory_space<vmem>>, vector<1x1x8x8xbf16>
    %49 = vector.shape_cast %48 : vector<1x1x8x8xbf16> to vector<8x8xbf16>
    %50 = vector.shape_cast %47 : vector<8x8xbf16> to vector<1x1x8x8xbf16>
    tpu.vector_store %arg12[%c0_29, %c0_30, %c0_31, %c0_32], %50 {strides = array<i32>} : memref<1x4x8x8xbf16, #tpu.memory_space<vmem>>, vector<1x1x8x8xbf16>,
    %c0_33 = arith.constant 0 : index
    %c0_34 = arith.constant 0 : index
    %c0_35 = arith.constant 0 : index
    %51 = vector.load %arg9[%c0_33, %c0_34, %c0_35] : memref<4x32x8xbf16, #tpu.memory_space<vmem>>, vector<1x32x8xbf16>
    %52 = vector.shape_cast %51 : vector<1x32x8xbf16> to vector<32x8xbf16>
    %cst_36 = arith.constant dense<0.000000e+00> : vector<8x8xf32>
    %53 = tpu.matmul %26, %52, %cst_36 {dimension_numbers = #tpu.dot_dimension_numbers<[1], [0], [0], [1], [0, 0, 1, 1], [], []>} : vector<8x32xbf16>, vector<32x8xbf16>, vector<8x8xf32> -> vector<8x8xf32>
    %c0_37 = arith.constant 0 : index
    %c0_38 = arith.constant 0 : index
    %c0_39 = arith.constant 0 : index
    %54 = vector.load %arg10[%c0_37, %c0_38, %c0_39] : memref<4x1x8xf32, #tpu.memory_space<vmem>>, vector<1x1x8xf32>
    %55 = vector.shape_cast %54 : vector<1x1x8xf32> to vector<1x8xf32>
    %56 = vector.broadcast %55 : vector<1x8xf32> to vector<8x8xf32>
    %57 = arith.addf %53, %56 : vector<8x8xf32>
    %58 = arith.truncf %57 : vector<8x8xf32> to vector<8x8xbf16>
    %c0_40 = arith.constant 0 : index
    %c0_41 = arith.constant 0 : index
    %c0_42 = arith.constant 0 : index
    %c0_43 = arith.constant 0 : index
    %59 = vector.load %arg13[%c0_40, %c0_41, %c0_42, %c0_43] : memref<1x4x8x8xbf16, #tpu.memory_space<vmem>>, vector<1x1x8x8xbf16>
    %60 = vector.shape_cast %59 : vector<1x1x8x8xbf16> to vector<8x8xbf16>
    %61 = vector.shape_cast %58 : vector<8x8xbf16> to vector<1x1x8x8xbf16>
    tpu.vector_store %arg13[%c0_40, %c0_41, %c0_42, %c0_43], %61 {strides = array<i32>} : memref<1x4x8x8xbf16, #tpu.memory_space<vmem>>, vector<1x1x8x8xbf16>,
    %c1 = arith.constant 1 : index
    %c0_44 = arith.constant 0 : index
    %c0_45 = arith.constant 0 : index
    %62 = vector.load %arg5[%c1, %c0_44, %c0_45] : memref<4x32x8xbf16, #tpu.memory_space<vmem>>, vector<1x32x8xbf16>
    %63 = vector.shape_cast %62 : vector<1x32x8xbf16> to vector<32x8xbf16>
    %cst_46 = arith.constant dense<0.000000e+00> : vector<8x8xf32>
    %64 = tpu.matmul %26, %63, %cst_46 {dimension_numbers = #tpu.dot_dimension_numbers<[1], [0], [0], [1], [0, 0, 1, 1], [], []>} : vector<8x32xbf16>, vector<32x8xbf16>, vector<8x8xf32> -> vector<8x8xf32>
    %c1_47 = arith.constant 1 : index
    %c0_48 = arith.constant 0 : index
    %c0_49 = arith.constant 0 : index
    %65 = vector.load %arg6[%c1_47, %c0_48, %c0_49] : memref<4x1x8xf32, #tpu.memory_space<vmem>>, vector<1x1x8xf32>
    %66 = vector.shape_cast %65 : vector<1x1x8xf32> to vector<1x8xf32>
    %67 = vector.broadcast %66 : vector<1x8xf32> to vector<8x8xf32>
    %68 = arith.addf %64, %67 : vector<8x8xf32>
    %cst_50 = arith.constant 0.353553385 : f32
    %69 = vector.broadcast %cst_50 : f32 to vector<8x8xf32>
    %70 = arith.mulf %68, %69 : vector<8x8xf32>
    %71 = arith.truncf %70 : vector<8x8xf32> to vector<8x8xbf16>
    %c0_51 = arith.constant 0 : index
    %c1_52 = arith.constant 1 : index
    %c0_53 = arith.constant 0 : index
    %c0_54 = arith.constant 0 : index
    %72 = vector.load %arg11[%c0_51, %c1_52, %c0_53, %c0_54] : memref<1x4x8x8xbf16, #tpu.memory_space<vmem>>, vector<1x1x8x8xbf16>
    %73 = vector.shape_cast %72 : vector<1x1x8x8xbf16> to vector<8x8xbf16>
    %74 = vector.shape_cast %71 : vector<8x8xbf16> to vector<1x1x8x8xbf16>
    tpu.vector_store %arg11[%c0_51, %c1_52, %c0_53, %c0_54], %74 {strides = array<i32>} : memref<1x4x8x8xbf16, #tpu.memory_space<vmem>>, vector<1x1x8x8xbf16>,
    %c1_55 = arith.constant 1 : index
    %c0_56 = arith.constant 0 : index
    %c0_57 = arith.constant 0 : index
    %75 = vector.load %arg7[%c1_55, %c0_56, %c0_57] : memref<4x32x8xbf16, #tpu.memory_space<vmem>>, vector<1x32x8xbf16>
    %76 = vector.shape_cast %75 : vector<1x32x8xbf16> to vector<32x8xbf16>
    %cst_58 = arith.constant dense<0.000000e+00> : vector<8x8xf32>
    %77 = tpu.matmul %26, %76, %cst_58 {dimension_numbers = #tpu.dot_dimension_numbers<[1], [0], [0], [1], [0, 0, 1, 1], [], []>} : vector<8x32xbf16>, vector<32x8xbf16>, vector<8x8xf32> -> vector<8x8xf32>
    %c1_59 = arith.constant 1 : index
    %c0_60 = arith.constant 0 : index
    %c0_61 = arith.constant 0 : index
    %78 = vector.load %arg8[%c1_59, %c0_60, %c0_61] : memref<4x1x8xf32, #tpu.memory_space<vmem>>, vector<1x1x8xf32>
    %79 = vector.shape_cast %78 : vector<1x1x8xf32> to vector<1x8xf32>
    %80 = vector.broadcast %79 : vector<1x8xf32> to vector<8x8xf32>
    %81 = arith.addf %77, %80 : vector<8x8xf32>
    %82 = arith.truncf %81 : vector<8x8xf32> to vector<8x8xbf16>
    %c0_62 = arith.constant 0 : index
    %c1_63 = arith.constant 1 : index
    %c0_64 = arith.constant 0 : index
    %c0_65 = arith.constant 0 : index
    %83 = vector.load %arg12[%c0_62, %c1_63, %c0_64, %c0_65] : memref<1x4x8x8xbf16, #tpu.memory_space<vmem>>, vector<1x1x8x8xbf16>
    %84 = vector.shape_cast %83 : vector<1x1x8x8xbf16> to vector<8x8xbf16>
    %85 = vector.shape_cast %82 : vector<8x8xbf16> to vector<1x1x8x8xbf16>
    tpu.vector_store %arg12[%c0_62, %c1_63, %c0_64, %c0_65], %85 {strides = array<i32>} : memref<1x4x8x8xbf16, #tpu.memory_space<vmem>>, vector<1x1x8x8xbf16>,
    %c1_66 = arith.constant 1 : index
    %c0_67 = arith.constant 0 : index
    %c0_68 = arith.constant 0 : index
    %86 = vector.load %arg9[%c1_66, %c0_67, %c0_68] : memref<4x32x8xbf16, #tpu.memory_space<vmem>>, vector<1x32x8xbf16>
    %87 = vector.shape_cast %86 : vector<1x32x8xbf16> to vector<32x8xbf16>
    %cst_69 = arith.constant dense<0.000000e+00> : vector<8x8xf32>
    %88 = tpu.matmul %26, %87, %cst_69 {dimension_numbers = #tpu.dot_dimension_numbers<[1], [0], [0], [1], [0, 0, 1, 1], [], []>} : vector<8x32xbf16>, vector<32x8xbf16>, vector<8x8xf32> -> vector<8x8xf32>
    %c1_70 = arith.constant 1 : index
    %c0_71 = arith.constant 0 : index
    %c0_72 = arith.constant 0 : index
    %89 = vector.load %arg10[%c1_70, %c0_71, %c0_72] : memref<4x1x8xf32, #tpu.memory_space<vmem>>, vector<1x1x8xf32>
    %90 = vector.shape_cast %89 : vector<1x1x8xf32> to vector<1x8xf32>
    %91 = vector.broadcast %90 : vector<1x8xf32> to vector<8x8xf32>
    %92 = arith.addf %88, %91 : vector<8x8xf32>
    %93 = arith.truncf %92 : vector<8x8xf32> to vector<8x8xbf16>
    %c0_73 = arith.constant 0 : index
    %c1_74 = arith.constant 1 : index
    %c0_75 = arith.constant 0 : index
    %c0_76 = arith.constant 0 : index
    %94 = vector.load %arg13[%c0_73, %c1_74, %c0_75, %c0_76] : memref<1x4x8x8xbf16, #tpu.memory_space<vmem>>, vector<1x1x8x8xbf16>
    %95 = vector.shape_cast %94 : vector<1x1x8x8xbf16> to vector<8x8xbf16>
    %96 = vector.shape_cast %93 : vector<8x8xbf16> to vector<1x1x8x8xbf16>
    tpu.vector_store %arg13[%c0_73, %c1_74, %c0_75, %c0_76], %96 {strides = array<i32>} : memref<1x4x8x8xbf16, #tpu.memory_space<vmem>>, vector<1x1x8x8xbf16>,
    %c2 = arith.constant 2 : index
    %c0_77 = arith.constant 0 : index
    %c0_78 = arith.constant 0 : index
    %97 = vector.load %arg5[%c2, %c0_77, %c0_78] : memref<4x32x8xbf16, #tpu.memory_space<vmem>>, vector<1x32x8xbf16>
    %98 = vector.shape_cast %97 : vector<1x32x8xbf16> to vector<32x8xbf16>
    %cst_79 = arith.constant dense<0.000000e+00> : vector<8x8xf32>
    %99 = tpu.matmul %26, %98, %cst_79 {dimension_numbers = #tpu.dot_dimension_numbers<[1], [0], [0], [1], [0, 0, 1, 1], [], []>} : vector<8x32xbf16>, vector<32x8xbf16>, vector<8x8xf32> -> vector<8x8xf32>
    %c2_80 = arith.constant 2 : index
    %c0_81 = arith.constant 0 : index
    %c0_82 = arith.constant 0 : index
    %100 = vector.load %arg6[%c2_80, %c0_81, %c0_82] : memref<4x1x8xf32, #tpu.memory_space<vmem>>, vector<1x1x8xf32>
    %101 = vector.shape_cast %100 : vector<1x1x8xf32> to vector<1x8xf32>
    %102 = vector.broadcast %101 : vector<1x8xf32> to vector<8x8xf32>
    %103 = arith.addf %99, %102 : vector<8x8xf32>
    %cst_83 = arith.constant 0.353553385 : f32
    %104 = vector.broadcast %cst_83 : f32 to vector<8x8xf32>
    %105 = arith.mulf %103, %104 : vector<8x8xf32>
    %106 = arith.truncf %105 : vector<8x8xf32> to vector<8x8xbf16>
    %c0_84 = arith.constant 0 : index
    %c2_85 = arith.constant 2 : index
    %c0_86 = arith.constant 0 : index
    %c0_87 = arith.constant 0 : index
    %107 = vector.load %arg11[%c0_84, %c2_85, %c0_86, %c0_87] : memref<1x4x8x8xbf16, #tpu.memory_space<vmem>>, vector<1x1x8x8xbf16>
    %108 = vector.shape_cast %107 : vector<1x1x8x8xbf16> to vector<8x8xbf16>
    %109 = vector.shape_cast %106 : vector<8x8xbf16> to vector<1x1x8x8xbf16>
    tpu.vector_store %arg11[%c0_84, %c2_85, %c0_86, %c0_87], %109 {strides = array<i32>} : memref<1x4x8x8xbf16, #tpu.memory_space<vmem>>, vector<1x1x8x8xbf16>,
    %c2_88 = arith.constant 2 : index
    %c0_89 = arith.constant 0 : index
    %c0_90 = arith.constant 0 : index
    %110 = vector.load %arg7[%c2_88, %c0_89, %c0_90] : memref<4x32x8xbf16, #tpu.memory_space<vmem>>, vector<1x32x8xbf16>
    %111 = vector.shape_cast %110 : vector<1x32x8xbf16> to vector<32x8xbf16>
    %cst_91 = arith.constant dense<0.000000e+00> : vector<8x8xf32>
    %112 = tpu.matmul %26, %111, %cst_91 {dimension_numbers = #tpu.dot_dimension_numbers<[1], [0], [0], [1], [0, 0, 1, 1], [], []>} : vector<8x32xbf16>, vector<32x8xbf16>, vector<8x8xf32> -> vector<8x8xf32>
    %c2_92 = arith.constant 2 : index
    %c0_93 = arith.constant 0 : index
    %c0_94 = arith.constant 0 : index
    %113 = vector.load %arg8[%c2_92, %c0_93, %c0_94] : memref<4x1x8xf32, #tpu.memory_space<vmem>>, vector<1x1x8xf32>
    %114 = vector.shape_cast %113 : vector<1x1x8xf32> to vector<1x8xf32>
    %115 = vector.broadcast %114 : vector<1x8xf32> to vector<8x8xf32>
    %116 = arith.addf %112, %115 : vector<8x8xf32>
    %117 = arith.truncf %116 : vector<8x8xf32> to vector<8x8xbf16>
    %c0_95 = arith.constant 0 : index
    %c2_96 = arith.constant 2 : index
    %c0_97 = arith.constant 0 : index
    %c0_98 = arith.constant 0 : index
    %118 = vector.load %arg12[%c0_95, %c2_96, %c0_97, %c0_98] : memref<1x4x8x8xbf16, #tpu.memory_space<vmem>>, vector<1x1x8x8xbf16>
    %119 = vector.shape_cast %118 : vector<1x1x8x8xbf16> to vector<8x8xbf16>
    %120 = vector.shape_cast %117 : vector<8x8xbf16> to vector<1x1x8x8xbf16>
    tpu.vector_store %arg12[%c0_95, %c2_96, %c0_97, %c0_98], %120 {strides = array<i32>} : memref<1x4x8x8xbf16, #tpu.memory_space<vmem>>, vector<1x1x8x8xbf16>,
    %c2_99 = arith.constant 2 : index
    %c0_100 = arith.constant 0 : index
    %c0_101 = arith.constant 0 : index
    %121 = vector.load %arg9[%c2_99, %c0_100, %c0_101] : memref<4x32x8xbf16, #tpu.memory_space<vmem>>, vector<1x32x8xbf16>
    %122 = vector.shape_cast %121 : vector<1x32x8xbf16> to vector<32x8xbf16>
    %cst_102 = arith.constant dense<0.000000e+00> : vector<8x8xf32>
    %123 = tpu.matmul %26, %122, %cst_102 {dimension_numbers = #tpu.dot_dimension_numbers<[1], [0], [0], [1], [0, 0, 1, 1], [], []>} : vector<8x32xbf16>, vector<32x8xbf16>, vector<8x8xf32> -> vector<8x8xf32>
    %c2_103 = arith.constant 2 : index
    %c0_104 = arith.constant 0 : index
    %c0_105 = arith.constant 0 : index
    %124 = vector.load %arg10[%c2_103, %c0_104, %c0_105] : memref<4x1x8xf32, #tpu.memory_space<vmem>>, vector<1x1x8xf32>
    %125 = vector.shape_cast %124 : vector<1x1x8xf32> to vector<1x8xf32>
    %126 = vector.broadcast %125 : vector<1x8xf32> to vector<8x8xf32>
    %127 = arith.addf %123, %126 : vector<8x8xf32>
    %128 = arith.truncf %127 : vector<8x8xf32> to vector<8x8xbf16>
    %c0_106 = arith.constant 0 : index
    %c2_107 = arith.constant 2 : index
    %c0_108 = arith.constant 0 : index
    %c0_109 = arith.constant 0 : index
    %129 = vector.load %arg13[%c0_106, %c2_107, %c0_108, %c0_109] : memref<1x4x8x8xbf16, #tpu.memory_space<vmem>>, vector<1x1x8x8xbf16>
    %130 = vector.shape_cast %129 : vector<1x1x8x8xbf16> to vector<8x8xbf16>
    %131 = vector.shape_cast %128 : vector<8x8xbf16> to vector<1x1x8x8xbf16>
    tpu.vector_store %arg13[%c0_106, %c2_107, %c0_108, %c0_109], %131 {strides = array<i32>} : memref<1x4x8x8xbf16, #tpu.memory_space<vmem>>, vector<1x1x8x8xbf16>,
    %c3 = arith.constant 3 : index
    %c0_110 = arith.constant 0 : index
    %c0_111 = arith.constant 0 : index
    %132 = vector.load %arg5[%c3, %c0_110, %c0_111] : memref<4x32x8xbf16, #tpu.memory_space<vmem>>, vector<1x32x8xbf16>
    %133 = vector.shape_cast %132 : vector<1x32x8xbf16> to vector<32x8xbf16>
    %cst_112 = arith.constant dense<0.000000e+00> : vector<8x8xf32>
    %134 = tpu.matmul %26, %133, %cst_112 {dimension_numbers = #tpu.dot_dimension_numbers<[1], [0], [0], [1], [0, 0, 1, 1], [], []>} : vector<8x32xbf16>, vector<32x8xbf16>, vector<8x8xf32> -> vector<8x8xf32>
    %c3_113 = arith.constant 3 : index
    %c0_114 = arith.constant 0 : index
    %c0_115 = arith.constant 0 : index
    %135 = vector.load %arg6[%c3_113, %c0_114, %c0_115] : memref<4x1x8xf32, #tpu.memory_space<vmem>>, vector<1x1x8xf32>
    %136 = vector.shape_cast %135 : vector<1x1x8xf32> to vector<1x8xf32>
    %137 = vector.broadcast %136 : vector<1x8xf32> to vector<8x8xf32>
    %138 = arith.addf %134, %137 : vector<8x8xf32>
    %cst_116 = arith.constant 0.353553385 : f32
    %139 = vector.broadcast %cst_116 : f32 to vector<8x8xf32>
    %140 = arith.mulf %138, %139 : vector<8x8xf32>
    %141 = arith.truncf %140 : vector<8x8xf32> to vector<8x8xbf16>
    %c0_117 = arith.constant 0 : index
    %c3_118 = arith.constant 3 : index
    %c0_119 = arith.constant 0 : index
    %c0_120 = arith.constant 0 : index
    %142 = vector.load %arg11[%c0_117, %c3_118, %c0_119, %c0_120] : memref<1x4x8x8xbf16, #tpu.memory_space<vmem>>, vector<1x1x8x8xbf16>
    %143 = vector.shape_cast %142 : vector<1x1x8x8xbf16> to vector<8x8xbf16>
    %144 = vector.shape_cast %141 : vector<8x8xbf16> to vector<1x1x8x8xbf16>
    tpu.vector_store %arg11[%c0_117, %c3_118, %c0_119, %c0_120], %144 {strides = array<i32>} : memref<1x4x8x8xbf16, #tpu.memory_space<vmem>>, vector<1x1x8x8xbf16>,
    %c3_121 = arith.constant 3 : index
    %c0_122 = arith.constant 0 : index
    %c0_123 = arith.constant 0 : index
    %145 = vector.load %arg7[%c3_121, %c0_122, %c0_123] : memref<4x32x8xbf16, #tpu.memory_space<vmem>>, vector<1x32x8xbf16>
    %146 = vector.shape_cast %145 : vector<1x32x8xbf16> to vector<32x8xbf16>
    %cst_124 = arith.constant dense<0.000000e+00> : vector<8x8xf32>
    %147 = tpu.matmul %26, %146, %cst_124 {dimension_numbers = #tpu.dot_dimension_numbers<[1], [0], [0], [1], [0, 0, 1, 1], [], []>} : vector<8x32xbf16>, vector<32x8xbf16>, vector<8x8xf32> -> vector<8x8xf32>
    %c3_125 = arith.constant 3 : index
    %c0_126 = arith.constant 0 : index
    %c0_127 = arith.constant 0 : index
    %148 = vector.load %arg8[%c3_125, %c0_126, %c0_127] : memref<4x1x8xf32, #tpu.memory_space<vmem>>, vector<1x1x8xf32>
    %149 = vector.shape_cast %148 : vector<1x1x8xf32> to vector<1x8xf32>
    %150 = vector.broadcast %149 : vector<1x8xf32> to vector<8x8xf32>
    %151 = arith.addf %147, %150 : vector<8x8xf32>
    %152 = arith.truncf %151 : vector<8x8xf32> to vector<8x8xbf16>
    %c0_128 = arith.constant 0 : index
    %c3_129 = arith.constant 3 : index
    %c0_130 = arith.constant 0 : index
    %c0_131 = arith.constant 0 : index
    %153 = vector.load %arg12[%c0_128, %c3_129, %c0_130, %c0_131] : memref<1x4x8x8xbf16, #tpu.memory_space<vmem>>, vector<1x1x8x8xbf16>
    %154 = vector.shape_cast %153 : vector<1x1x8x8xbf16> to vector<8x8xbf16>
    %155 = vector.shape_cast %152 : vector<8x8xbf16> to vector<1x1x8x8xbf16>
    tpu.vector_store %arg12[%c0_128, %c3_129, %c0_130, %c0_131], %155 {strides = array<i32>} : memref<1x4x8x8xbf16, #tpu.memory_space<vmem>>, vector<1x1x8x8xbf16>,
    %c3_132 = arith.constant 3 : index
    %c0_133 = arith.constant 0 : index
    %c0_134 = arith.constant 0 : index
    %156 = vector.load %arg9[%c3_132, %c0_133, %c0_134] : memref<4x32x8xbf16, #tpu.memory_space<vmem>>, vector<1x32x8xbf16>
    %157 = vector.shape_cast %156 : vector<1x32x8xbf16> to vector<32x8xbf16>
    %cst_135 = arith.constant dense<0.000000e+00> : vector<8x8xf32>
    %158 = tpu.matmul %26, %157, %cst_135 {dimension_numbers = #tpu.dot_dimension_numbers<[1], [0], [0], [1], [0, 0, 1, 1], [], []>} : vector<8x32xbf16>, vector<32x8xbf16>, vector<8x8xf32> -> vector<8x8xf32>
    %c3_136 = arith.constant 3 : index
    %c0_137 = arith.constant 0 : index
    %c0_138 = arith.constant 0 : index
    %159 = vector.load %arg10[%c3_136, %c0_137, %c0_138] : memref<4x1x8xf32, #tpu.memory_space<vmem>>, vector<1x1x8xf32>
    %160 = vector.shape_cast %159 : vector<1x1x8xf32> to vector<1x8xf32>
    %161 = vector.broadcast %160 : vector<1x8xf32> to vector<8x8xf32>
    %162 = arith.addf %158, %161 : vector<8x8xf32>
    %163 = arith.truncf %162 : vector<8x8xf32> to vector<8x8xbf16>
    %c0_139 = arith.constant 0 : index
    %c3_140 = arith.constant 3 : index
    %c0_141 = arith.constant 0 : index
    %c0_142 = arith.constant 0 : index
    %164 = vector.load %arg13[%c0_139, %c3_140, %c0_141, %c0_142] : memref<1x4x8x8xbf16, #tpu.memory_space<vmem>>, vector<1x1x8x8xbf16>
    %165 = vector.shape_cast %164 : vector<1x1x8x8xbf16> to vector<8x8xbf16>
    %166 = vector.shape_cast %163 : vector<8x8xbf16> to vector<1x1x8x8xbf16>
    tpu.vector_store %arg13[%c0_139, %c3_140, %c0_141, %c0_142], %166 {strides = array<i32>} : memref<1x4x8x8xbf16, #tpu.memory_space<vmem>>, vector<1x1x8x8xbf16>,
    return
  }
  func.func @transform_0(%arg0: i32, %arg1: i32) -> (i32, i32, i32) {
    %c0_i32 = arith.constant 0 : i32
    %c0_i32_0 = arith.constant 0 : i32
    return %arg0, %arg1, %c0_i32 : i32, i32, i32
  }
  func.func @transform_1(%arg0: i32, %arg1: i32) -> (i32, i32) {
    %c0_i32 = arith.constant 0 : i32
    %c0_i32_0 = arith.constant 0 : i32
    %c0_i32_1 = arith.constant 0 : i32
    return %c0_i32, %c0_i32_0 : i32, i32
  }
  func.func @transform_2(%arg0: i32, %arg1: i32) -> (i32, i32) {
    %c0_i32 = arith.constant 0 : i32
    %c0_i32_0 = arith.constant 0 : i32
    %c0_i32_1 = arith.constant 0 : i32
    return %c0_i32, %c0_i32_0 : i32, i32
  }
  func.func @transform_3(%arg0: i32, %arg1: i32) -> (i32, i32, i32) {
    %c0_i32 = arith.constant 0 : i32
    %c0_i32_0 = arith.constant 0 : i32
    %c0_i32_1 = arith.constant 0 : i32
    %c0_i32_2 = arith.constant 0 : i32
    return %c0_i32, %c0_i32_0, %c0_i32_1 : i32, i32, i32
  }
  func.func @transform_4(%arg0: i32, %arg1: i32) -> (i32, i32, i32) {
    %c0_i32 = arith.constant 0 : i32
    %c0_i32_0 = arith.constant 0 : i32
    %c0_i32_1 = arith.constant 0 : i32
    %c0_i32_2 = arith.constant 0 : i32
    return %c0_i32, %c0_i32_0, %c0_i32_1 : i32, i32, i32
  }
  func.func @transform_5(%arg0: i32, %arg1: i32) -> (i32, i32, i32) {
    %c0_i32 = arith.constant 0 : i32
    %c0_i32_0 = arith.constant 0 : i32
    %c0_i32_1 = arith.constant 0 : i32
    %c0_i32_2 = arith.constant 0 : i32
    return %c0_i32, %c0_i32_0, %c0_i32_1 : i32, i32, i32
  }
  func.func @transform_6(%arg0: i32, %arg1: i32) -> (i32, i32, i32) {
    %c0_i32 = arith.constant 0 : i32
    %c0_i32_0 = arith.constant 0 : i32
    %c0_i32_1 = arith.constant 0 : i32
    %c0_i32_2 = arith.constant 0 : i32
    return %c0_i32, %c0_i32_0, %c0_i32_1 : i32, i32, i32
  }
  func.func @transform_7(%arg0: i32, %arg1: i32) -> (i32, i32, i32) {
    %c0_i32 = arith.constant 0 : i32
    %c0_i32_0 = arith.constant 0 : i32
    %c0_i32_1 = arith.constant 0 : i32
    %c0_i32_2 = arith.constant 0 : i32
    return %c0_i32, %c0_i32_0, %c0_i32_1 : i32, i32, i32
  }
  func.func @transform_8(%arg0: i32, %arg1: i32) -> (i32, i32, i32) {
    %c0_i32 = arith.constant 0 : i32
    %c0_i32_0 = arith.constant 0 : i32
    %c0_i32_1 = arith.constant 0 : i32
    %c0_i32_2 = arith.constant 0 : i32
    return %c0_i32, %c0_i32_0, %c0_i32_1 : i32, i32, i32
  }
  func.func @transform_9(%arg0: i32, %arg1: i32) -> (i32, i32, i32, i32) {
    %c0_i32 = arith.constant 0 : i32
    %c0_i32_0 = arith.constant 0 : i32
    %c0_i32_1 = arith.constant 0 : i32
    return %arg0, %c0_i32, %arg1, %c0_i32_0 : i32, i32, i32, i32
  }
  func.func @transform_10(%arg0: i32, %arg1: i32) -> (i32, i32, i32, i32) {
    %c0_i32 = arith.constant 0 : i32
    %c0_i32_0 = arith.constant 0 : i32
    %c0_i32_1 = arith.constant 0 : i32
    return %arg0, %c0_i32, %arg1, %c0_i32_0 : i32, i32, i32, i32
  }
  func.func @transform_11(%arg0: i32, %arg1: i32) -> (i32, i32, i32, i32) {
    %c0_i32 = arith.constant 0 : i32
    %c0_i32_0 = arith.constant 0 : i32
    %c0_i32_1 = arith.constant 0 : i32
    return %arg0, %c0_i32, %arg1, %c0_i32_0 : i32, i32, i32, i32
  }
}

</mosaic_0001>

<bundles_post_ra>
// kernel: tpu_custom_call.1
= control target key start
LH: loop header
LB: loop body
LE: loop exit
PB: predicated region body
PF: predicated region fallthrough
CT: control target
= control target key end

     0   :  { %s2472_s0 = inlined_call_operand.vmem [shape: f32[2,8,32], index: 0, kind: input, shape index: {}]   ;;  %s2473_s1 = inlined_call_operand.vmem [shape: f32[1,32], index: 1, kind: input, shape index: {}]   ;;  %s2474_s2 = inlined_call_operand.vmem [shape: f32[1,32], index: 2, kind: input, shape index: {}]   ;;  %s2475_s3 = inlined_call_operand.vmem [shape: bf16[4,32,8], index: 3, kind: input, shape index: {}]   ;;  %s2476_s4 = inlined_call_operand.vmem [shape: f32[4,1,8], index: 4, kind: input, shape index: {}]   ;;  %s2477_s5 = inlined_call_operand.vmem [shape: bf16[4,32,8], index: 5, kind: input, shape index: {}]   ;;  %s2478_s6 = inlined_call_operand.vmem [shape: f32[4,1,8], index: 6, kind: input, shape index: {}]   ;;  %s2479_s7 = inlined_call_operand.vmem [shape: bf16[4,32,8], index: 7, kind: input, shape index: {}]   ;;  %s2480_s8 = inlined_call_operand.vmem [shape: f32[4,1,8], index: 8, kind: input, shape index: {}]   ;;  %s2481_s9 = inlined_call_operand.hbm [shape: bf16[2,4,8,8], index: 9, kind: output, shape index: {0}]   ;;  %s2482_s10 = inlined_call_operand.hbm [shape: bf16[2,4,8,8], index: 10, kind: output, shape index: {1}]   ;;  %s2483_s11 = inlined_call_operand.hbm [shape: bf16[2,4,8,8], index: 11, kind: output, shape index: {2}]  }
   0x1   :  { %2489 = sst [smem:[#allocation9_spill]] %s2472_s0 }
   0x2   :  { %2490 = sst [smem:[#allocation10_spill]] %s2473_s1 }
   0x3   :  { %2491 = sst [smem:[#allocation11_spill]] %s2474_s2 }
   0x4   :  { %2492 = sst [smem:[#allocation12_spill]] %s2475_s3 }
   0x5   :  { %2493 = sst [smem:[#allocation13_spill]] %s2476_s4 }
   0x6   :  { %2494 = sst [smem:[#allocation14_spill]] %s2477_s5 }
   0x7   :  { %17 = vsyncpa [#allocation3], 0 }
   0x8   :  { %19 = vsyncpa [#allocation3 + $0x1], 0 }
   0x9   :  { %20 = vsyncpa [#allocation5], 0 }
   0xa   :  { %22 = vsyncpa [#allocation5 + $0x1], 0  ;;  %s2038_s17 = smov 0   ;;  %s2040_s18 = smov 0  }
   0xb   :  { %s2042_s19 = smov 0   ;;  %s2044_s20 = smov 0  }
   0xc   :  { %s2046_s21 = smov 0   ;;  %s2048_s22 = smov 0  }
   0xd LB: > { %s2486_s23 = sadd.s32 4294967295, %s1969_s22   ;;  %s2484_s24 = sadd.s32 4294967294, %s1969_s22   ;;  %s1969_s22 = sphi %s2048_s22, %s28_s22   ;;  %s1965_s21 = sphi %s2046_s21, %s2511_s21   ;;  %s1961_s20 = sphi %s2044_s20, %s2510_s20   ;;  %s1957_s19 = sphi %s2042_s19, %s2509_s19   ;;  %s1953_s18 = sphi %s2040_s18, %s2508_s18   ;;  %s1949_s17 = sphi %s2038_s17, %s2507_s17  }
   0xe   : > { %s40_s25 = sadd.s32 1, %s1965_s21  ;;  %s245_s26 = sadd.s32 1, %s1957_s19 }
   0xf   : > { %p42_p0 = scmp.ge.s32.totalorder %s40_s25, 2  ;;  %p255_p1 = scmp.ne.s32.totalorder %s1957_s19, %s1953_s18 }
  0x10   : > { %p256_p2 = scmp.eq.s32.totalorder %s2486_s23, 1  ;;  %p261_p3 = scmp.ne.s32.totalorder %s1953_s18, %s1949_s17 }
  0x11   : > { %s2513_s25 = smov (%p42_p0, %s40_s25), 0  ;;  %p262_p5 = scmp.eq.s32.totalorder %s2484_s24, 1 }
  0x12   : > { %p2080_p4 = por %p256_p2, %p255_p1  ;;  %s240_s28 = ssub.s32 %s1965_s21, %s2513_s25 }
  0x13   : > { %p1481_p6 = scmp.ge.s32.totalorder %s1969_s22, 1  ;;  %p243_p7 = scmp.eq.s32.totalorder %s240_s28, 0 }
  0x14   : > { %p2089_p8 = por %p262_p5, %p261_p3  ;;  %p370_p9 = scmp.lt.s32.totalorder %s1969_s22, 3 }
  0x15   : > { %s2095_s30 = scalar_select %p243_p7, %s1957_s19, %s245_s26  }
  0x16   : > { %p371_p10 = pnand %p1481_p6, %p370_p9 }
  0x17   : > { %p422_p11 = scmp.lt.s32.totalorder (!%p371_p10), %s1961_s20, 1  ;;  %vm433_vm0 = vcmask (!%p371_p10), 261120   ;;  %s2497_s0 = sld [smem:[#allocation9_spill]] (!%p371_p10)  ;;  %v1971_v9 = vmov (!%p371_p10), 0.0   ;;  %vm1972_vm1 = vmmov (!%p371_p10), 0   ;;  %v1809_v21 = vld [vmem:[%s2479_s7] sm:$0xff] (!%p371_p10)  }
  0x18   : > { %374 = sbr.rel (%p371_p10) target bundleno = 664 (0x298), region = 56  ;;  %s2498_s3 = sld [smem:[#allocation12_spill]] (!%p371_p10)  ;;  %1640 = vmatprep.subr.bf16.mxu0 (!%p371_p10), %v1971_v9  ;;  %1648 = vmatprep.subr.bf16.mxu1 (!%p371_p10), %v1971_v9  ;;  %v1811_v24 = vld [vmem:[%s2479_s7 + $0x8] sm:$0xff] (!%p371_p10)   ;;  %v1814_v27 = vld [vmem:[%s2479_s7 + $0x10] sm:$0xff] (!%p371_p10)   ;;  %v1816_v29 = vld [vmem:[%s2479_s7 + $0x18] sm:$0xff] (!%p371_p10)   ;;  %vm531_vm2 = vcmask (!%p371_p10), 60416  }
  0x19   : > { %s2499_s5 = sld [smem:[#allocation14_spill]] (!%p371_p10)  ;;  %1644 = vmatprep.mubr.msk.bf16.mxu0 (!%p371_p10), %vm1972_vm1, %v1971_v9  ;;  %1652 = vmatprep.mubr.msk.bf16.mxu1 (!%p371_p10), %vm1972_vm1, %v1971_v9  ;;  %s2500_s1 = sld [smem:[#allocation10_spill]] (!%p371_p10)  ;;  %v1821_v34 = vld [vmem:[%s2479_s7 + $0x20] sm:$0xff] (!%p371_p10)   ;;  %v1823_v36 = vld [vmem:[%s2479_s7 + $0x28] sm:$0xff] (!%p371_p10)   ;;  %v1826_v39 = vld [vmem:[%s2479_s7 + $0x30] sm:$0xff] (!%p371_p10)  }
  0x1a   : > { %s2501_s2 = sld [smem:[#allocation11_spill]] (!%p371_p10)  ;;  %v1828_v41 = vld [vmem:[%s2479_s7 + $0x38] sm:$0xff] (!%p371_p10)   ;;  %s2502_s4 = sld [smem:[#allocation13_spill]] (!%p371_p10)  ;;  %v1492_v43 = vld [vmem:[%s2478_s6] ss:$0 sm:$0xff] (!%p371_p10) }
  0x1b   : > { %v1496_v57 = vld [vmem:[%s2480_s8] ss:$0 sm:$0xff] (!%p371_p10)  ;;  %s1973_s23 = smov (!%p371_p10), [#allocation2]  }
  0x1e   : > { %v1805_v7 = vld [vmem:[%s2498_s3] sm:$0xff] (!%p371_p10)   ;;  %v1807_v10 = vld [vmem:[%s2498_s3 + $0x8] sm:$0xff] (!%p371_p10)   ;;  %v1810_v22 = vld [vmem:[%s2498_s3 + $0x10] sm:$0xff] (!%p371_p10)  }
  0x1f   : > { %s423_s12 = scalar_select %p422_p11, %s1961_s20, 1  ;;  %v1806_v8 = vld [vmem:[%s2499_s5] sm:$0xff]   ;;  %1641 = vmatpush3.bf16.msra.mxu0 %v1805_v7  ;;  %v1808_v11 = vld [vmem:[%s2499_s5 + $0x8] sm:$0xff]   ;;  %v1812_v25 = vld [vmem:[%s2498_s3 + $0x18] sm:$0xff]  }
  0x20   : > { %1649 = vmatpush3.bf16.msra.mxu1 %v1806_v8  ;;  %1642 = vmatprep.subr.bf16.mxu0 %v1971_v9  ;;  %v1486_v16 = vld [vmem:[%s2500_s1] ss:$0 sm:$0xff]  ;;  %v1813_v26 = vld [vmem:[%s2499_s5 + $0x10] sm:$0xff]   ;;  %v1815_v28 = vld [vmem:[%s2499_s5 + $0x18] sm:$0xff]  }
  0x21   : > { %s1485_s13 = sshll.u32 %s423_s12, 3  ;;  %1650 = vmatprep.subr.bf16.mxu1 %v1971_v9  ;;  %v1487_v18 = vld [vmem:[%s2501_s2] ss:$0 sm:$0xff]  ;;  %v1819_v32 = vld [vmem:[%s2498_s3 + $0x28] sm:$0xff]   ;;  %v1822_v35 = vld [vmem:[%s2498_s3 + $0x30] sm:$0xff]  }
  0x22   : > { %s428_s16 = scalar_lea.vmem %s2497_s0, %s1485_s13  ;;  %v1817_v30 = vld [vmem:[%s2498_s3 + $0x20] sm:$0xff]   ;;  %v1820_v33 = vld [vmem:[%s2499_s5 + $0x28] sm:$0xff]   ;;  %v1824_v37 = vld [vmem:[%s2498_s3 + $0x38] sm:$0xff]   ;;  %s2485_s13 = sand.u32 1, %s1953_s18  }
  0x23   : > { %v430_v0 = vld [vmem:[%s428_s16] sm:$0xff]  ;;  %1643 = vmatpush3.bf16.msra.mxu0 %v1807_v10  ;;  %v1825_v38 = vld [vmem:[%s2499_s5 + $0x30] sm:$0xff]   ;;  %v1827_v40 = vld [vmem:[%s2499_s5 + $0x38] sm:$0xff]   ;;  %s2265_s26 = sshll.u32 %s2485_s13, 4  ;;  %s2318_s16 = sshll.u32 %s1961_s20, 8 }
  0x24   : > { %v434_v1 = vsel %vm433_vm0, %v430_v0, 0.0  ;;  %1651 = vmatpush3.bf16.msra.mxu1 %v1808_v11  ;;  %1656 = vmatprep.subr.bf16.mxu0 %v1971_v9  ;;  %v1818_v31 = vld [vmem:[%s2499_s5 + $0x20] sm:$0xff]   ;;  %s2268_s28 = scalar_lea.vmem [#allocation4], %s2265_s26  ;;  %s2279_s24 = scalar_lea.vmem [#allocation2], %s2265_s26 }
  0x25   : > { %435 = vadd.xlane.f32.xlu0 %v434_v1  ;;  %1664 = vmatprep.subr.bf16.mxu1 %v1971_v9  ;;  %v1488_v42 = vld [vmem:[%s2502_s4] ss:$0 sm:$0xff]  ;;  %v1505_v58 = vld [vmem:[%s2502_s4 + $0x1] ss:$0 sm:$0xff]  ;;  %s2284_s12 = scalar_lea.vmem [#allocation6], %s2265_s26  ;;  %s1303_s15 = sshll.u32 %s2279_s24, 4  ;;  %s2320_s15 = int_to_ptr.vmem [resolvable:$true] %s1303_s15 }
  0x26   : > { %v1515_v8 = vld [vmem:[%s2478_s6 + $0x1] ss:$0 sm:$0xff]  ;;  %s2328_s14 = scalar_lea.hbm %s2481_s9, %s2318_s16  ;;  %s1320_s2 = sshll.u32 %s2268_s28, 4  ;;  %s2375_s2 = int_to_ptr.vmem [resolvable:$true] %s1320_s2 }
  0x27   : > { %s2503_s3 = sadd.s32 4294967295, %s1969_s22   ;;  %s2504_s13 = sand.u32 1, %s1953_s18  }
  0x28   : > { %s2345_s26 = scalar_lea.sflag [#allocation3], %s2504_s13  ;;  %s1831_s5 = scalar_lea.vmem %s2320_s15, 256 }
  0x29   : > { %p1832_p12 = scmp.ne.s32.totalorder %s2320_s15, %s1831_s5  ;;  %s1835_s0 = sshll.u32 %s1973_s23, 4  ;;  %s1836_s0 = int_to_ptr.vmem [resolvable:$false] %s1835_s0 }
  0x2a   : > { %s1837_s1 = scalar_lea.vmem %s1836_s0, 512  ;;  %p1838_p1 = scmp.lt.s32.totalorder %s2320_s15, %s1836_s0 }
  0x2b   : > { %p1833_p13 = pnand %p1832_p12, %p2080_p4  ;;  %p1839_p2 = scmp.lt.s32.totalorder %s1837_s1, %s1831_s5 }
  0x2d   : > { %p1834_p0 = pneg %p1833_p13  ;;  %p1840_p3 = por %p1839_p2, %p1838_p1 }
  0x2f   : > { %p1841_p5 = pnand %p1840_p3, %p1834_p0 }
  0xb2   : > { %v436_v2 = vpop.xlane.xlu0 %435 }
  0xb3   : > { %v438_v3 = vmul.f32 0.03125, %v436_v2 }
  0xb5   : > { %v439_v4 = vsub.f32 %v430_v0, %v438_v3 }
  0xb7   : > { %v440_v5 = vmul.f32 %v439_v4, %v439_v4 }
  0xb9   : > { %v441_v6 = vsel %vm433_vm0, %v440_v5, 0.0 }
  0xba   : > { %442 = vadd.xlane.f32.xlu0 %v441_v6 }
 0x147   : > { %v443_v12 = vpop.xlane.xlu0 %442 }
 0x148   : > { %v444_v13 = vmul.f32 0.03125, %v443_v12 }
 0x14a   : > { %v445_v14 = vadd.f32 1e-05, %v444_v13 }
 0x14c   : > { %1829 = vrsqrt.f32 %v445_v14 }
 0x156   : > { %v1830_v15 = vpop.eup %1829 }
 0x157   : > { %v447_v17 = vmul.f32 %v1830_v15, %v439_v4 }
 0x159   : > { %v454_v19 = vmul.f32 %v1486_v16, %v447_v17 }
 0x15b   : > { %v461_v20 = vadd.f32 %v1487_v18, %v454_v19 }
 0x15d   : > { %v2138_v23 = vpack.c.bf16 %v461_v20, %v461_v20 }
 0x15f   : > { %1645 = vmatmul.mubr.msk.bf16.vlgmr.msra.gmra.mrb[0].mxu0 %vm433_vm0, %v2138_v23  ;;  %1653 = vmatmul.mubr.msk.bf16.vlgmr.msra.gmra.mrb[0].mxu1 %vm433_vm0, %v2138_v23 }
 0x160   : > { %1657 = vmatpush3.bf16.msra.mxu0 %v1809_v21  ;;  %1665 = vmatpush3.bf16.msra.mxu1 %v1810_v22  ;;  %v1535_v22 = vld [vmem:[%s2502_s4 + $0x2] ss:$0 sm:$0xff] }
 0x161   : > { %1658 = vmatprep.subr.bf16.mxu0 %v1971_v9  ;;  %1666 = vmatprep.subr.bf16.mxu1 %v1971_v9 }
 0x162   : > { %1660 = vmatprep.mubr.msk.bf16.mxu0 %vm1972_vm1, %v1971_v9  ;;  %1668 = vmatprep.mubr.msk.bf16.mxu1 %vm1972_vm1, %v1971_v9 }
 0x164   : > { %1659 = vmatpush3.bf16.msra.mxu0 %v1811_v24  ;;  %1667 = vmatpush3.bf16.msra.mxu1 %v1812_v25 }
 0x165   : > { %1672 = vmatprep.subr.bf16.mxu0 %v1971_v9  ;;  %1680 = vmatprep.subr.bf16.mxu1 %v1971_v9 }
 0x167   : > { %1661 = vmatmul.mubr.msk.bf16.vlgmr.msra.gmra.mrb[4].mxu0 %vm433_vm0, %v2138_v23  ;;  %1669 = vmatmul.mubr.msk.bf16.vlgmr.msra.gmra.mrb[4].mxu1 %vm433_vm0, %v2138_v23 }
 0x168   : > { %1673 = vmatpush3.bf16.msra.mxu0 %v1813_v26  ;;  %1681 = vmatpush3.bf16.msra.mxu1 %v1814_v27 }
 0x169   : > { %1674 = vmatprep.subr.bf16.mxu0 %v1971_v9  ;;  %1682 = vmatprep.subr.bf16.mxu1 %v1971_v9 }
 0x16a   : > { %1676 = vmatprep.mubr.msk.bf16.mxu0 %vm1972_vm1, %v1971_v9  ;;  %1684 = vmatprep.mubr.msk.bf16.mxu1 %vm1972_vm1, %v1971_v9 }
 0x16c   : > { %1675 = vmatpush3.bf16.msra.mxu0 %v1815_v28  ;;  %1683 = vmatpush3.bf16.msra.mxu1 %v1816_v29 }
 0x16d   : > { %1688 = vmatprep.subr.bf16.mxu0 %v1971_v9  ;;  %1696 = vmatprep.subr.bf16.mxu1 %v1971_v9 }
 0x16f   : > { %1677 = vmatmul.mubr.msk.bf16.vlgmr.msra.gmra.mrb[8].mxu0 %vm433_vm0, %v2138_v23  ;;  %1685 = vmatmul.mubr.msk.bf16.vlgmr.msra.gmra.mrb[8].mxu1 %vm433_vm0, %v2138_v23 }
 0x170   : > { %1689 = vmatpush3.bf16.msra.mxu0 %v1817_v30  ;;  %1697 = vmatpush3.bf16.msra.mxu1 %v1818_v31 }
 0x171   : > { %1690 = vmatprep.subr.bf16.mxu0 %v1971_v9  ;;  %1698 = vmatprep.subr.bf16.mxu1 %v1971_v9 }
 0x172   : > { %1692 = vmatprep.mubr.msk.bf16.mxu0 %vm1972_vm1, %v1971_v9  ;;  %1700 = vmatprep.mubr.msk.bf16.mxu1 %vm1972_vm1, %v1971_v9 }
 0x174   : > { %1691 = vmatpush3.bf16.msra.mxu0 %v1819_v32  ;;  %1699 = vmatpush3.bf16.msra.mxu1 %v1820_v33 }
 0x175   : > { %1704 = vmatprep.subr.bf16.mxu0 %v1971_v9  ;;  %1712 = vmatprep.subr.bf16.mxu1 %v1971_v9 }
 0x177   : > { %1693 = vmatmul.mubr.msk.bf16.vlgmr.msra.gmra.mrb[12].mxu0 %vm433_vm0, %v2138_v23  ;;  %1701 = vmatmul.mubr.msk.bf16.vlgmr.msra.gmra.mrb[12].mxu1 %vm433_vm0, %v2138_v23 }
 0x178   : > { %1705 = vmatpush3.bf16.msra.mxu0 %v1821_v34  ;;  %1713 = vmatpush3.bf16.msra.mxu1 %v1822_v35 }
 0x179   : > { %1706 = vmatprep.subr.bf16.mxu0 %v1971_v9  ;;  %1714 = vmatprep.subr.bf16.mxu1 %v1971_v9 }
 0x17a   : > { %1708 = vmatprep.mubr.msk.bf16.mxu0 %vm1972_vm1, %v1971_v9  ;;  %1716 = vmatprep.mubr.msk.bf16.mxu1 %vm1972_vm1, %v1971_v9 }
 0x17c   : > { %1707 = vmatpush3.bf16.msra.mxu0 %v1823_v36  ;;  %1715 = vmatpush3.bf16.msra.mxu1 %v1824_v37  ;;  %v1555_v37 = vld [vmem:[%s2480_s8 + $0x2] ss:$0 sm:$0xff] }
 0x17d   : > { %1720 = vmatprep.subr.bf16.mxu0 %v1971_v9  ;;  %1728 = vmatprep.subr.bf16.mxu1 %v1971_v9 }
 0x17f   : > { %1709 = vmatmul.mubr.msk.bf16.vlgmr.msra.gmra.mrb[16].mxu0 %vm433_vm0, %v2138_v23  ;;  %1717 = vmatmul.mubr.msk.bf16.vlgmr.msra.gmra.mrb[16].mxu1 %vm433_vm0, %v2138_v23 }
 0x180   : > { %1721 = vmatpush3.bf16.msra.mxu0 %v1825_v38  ;;  %1729 = vmatpush3.bf16.msra.mxu1 %v1826_v39  ;;  %v1565_v38 = vld [vmem:[%s2502_s4 + $0x3] ss:$0 sm:$0xff]  ;;  %s2341_s4 = sand.u32 1, %s2503_s3  }
 0x181   : > { %1722 = vmatprep.subr.bf16.mxu0 %v1971_v9  ;;  %1730 = vmatprep.subr.bf16.mxu1 %v1971_v9 }
 0x182   : > { %1724 = vmatprep.mubr.msk.bf16.mxu0 %vm1972_vm1, %v1971_v9  ;;  %1732 = vmatprep.mubr.msk.bf16.mxu1 %vm1972_vm1, %v1971_v9  ;;  %v1525_v9 = vld [vmem:[%s2480_s8 + $0x1] ss:$0 sm:$0xff] }
 0x184   : > { %1723 = vmatpush3.bf16.msra.mxu0 %v1827_v40  ;;  %1731 = vmatpush3.bf16.msra.mxu1 %v1828_v41 }
 0x187   : > { %1725 = vmatmul.mubr.msk.bf16.vlgmr.msra.gmra.mrb[20].mxu0 %vm433_vm0, %v2138_v23  ;;  %1733 = vmatmul.mubr.msk.bf16.vlgmr.msra.gmra.mrb[20].mxu1 %vm433_vm0, %v2138_v23  ;;  %v1545_v23 = vld [vmem:[%s2478_s6 + $0x2] ss:$0 sm:$0xff] }
 0x232   : > { %v523_v44 = vpop.f32.mrb[0].mxu0  ;;  %v590_v45 = vpop.f32.mrb[0].mxu1 }
 0x233   : > { %v524_v46 = vadd.f32 %v1488_v42, %v523_v44  ;;  %v591_v47 = vadd.f32 %v1492_v43, %v590_v45  ;;  %v1646_v48 = vpop.f32.mrb[1].mxu0  ;;  %v1654_v49 = vpop.f32.mrb[1].mxu1 }
 0x234   : > { %v526_v50 = vpop.f32.mrb[2].mxu0  ;;  %v593_v51 = vpop.f32.mrb[2].mxu1 }
 0x235   : > { %v529_v52 = vmul.f32 0.35355338, %v524_v46  ;;  %v596_v53 = vpack.c.bf16 %v591_v47, %v591_v47  ;;  %v1647_v54 = vpop.f32.mrb[3].mxu0  ;;  %v1655_v55 = vpop.f32.mrb[3].mxu1 }
 0x237   : > { %v530_v56 = vpack.c.bf16 %v529_v52, %v529_v52  ;;  %597 = vst.msk [vmem:[%s2268_s28] sm:$0xf] %vm531_vm2, %v596_v53  ;;  %v1575_v52 = vld [vmem:[%s2478_s6 + $0x3] ss:$0 sm:$0xff] }
 0x238   : > { %v1585_v53 = vld [vmem:[%s2480_s8 + $0x3] ss:$0 sm:$0xff] }
 0x239   : > { %532 = vst.msk [vmem:[%s2279_s24] sm:$0xf] %vm531_vm2, %v530_v56 }
 0x23a   : > { %v655_v59 = vpop.f32.mrb[4].mxu0  ;;  %v722_v60 = vpop.f32.mrb[4].mxu1 }
 0x23b   : > { %v656_v61 = vadd.f32 %v1496_v57, %v655_v59  ;;  %v723_v62 = vadd.f32 %v1505_v58, %v722_v60  ;;  %v1662_v63 = vpop.f32.mrb[5].mxu0  ;;  %v1670_v0 = vpop.f32.mrb[5].mxu1 }
 0x23c   : > { %v658_v1 = vpop.f32.mrb[6].mxu0  ;;  %v725_v2 = vpop.f32.mrb[6].mxu1 }
 0x23d   : > { %v661_v3 = vpack.c.bf16 %v656_v61, %v656_v61  ;;  %v728_v4 = vmul.f32 0.35355338, %v723_v62  ;;  %v1663_v5 = vpop.f32.mrb[7].mxu0  ;;  %v1671_v6 = vpop.f32.mrb[7].mxu1 }
 0x23f   : > { %662 = vst.msk [vmem:[%s2284_s12] sm:$0xf] %vm531_vm2, %v661_v3  ;;  %v729_v7 = vpack.c.bf16 %v728_v4, %v728_v4 }
 0x241   : > { %1509 = vst.msk [vmem:[%s2279_s24 + $0x4] sm:$0xf] %vm531_vm2, %v729_v7 }
 0x242   : > { %v791_v10 = vpop.f32.mrb[8].mxu0  ;;  %v859_v11 = vpop.f32.mrb[8].mxu1 }
 0x243   : > { %v792_v12 = vadd.f32 %v1515_v8, %v791_v10  ;;  %v860_v13 = vadd.f32 %v1525_v9, %v859_v11  ;;  %v1678_v14 = vpop.f32.mrb[9].mxu0  ;;  %v1686_v15 = vpop.f32.mrb[9].mxu1 }
 0x244   : > { %v794_v16 = vpop.f32.mrb[10].mxu0  ;;  %v862_v17 = vpop.f32.mrb[10].mxu1 }
 0x245   : > { %v797_v18 = vpack.c.bf16 %v792_v12, %v792_v12  ;;  %v865_v19 = vpack.c.bf16 %v860_v13, %v860_v13  ;;  %v1679_v20 = vpop.f32.mrb[11].mxu0  ;;  %v1687_v21 = vpop.f32.mrb[11].mxu1 }
 0x247   : > { %1519 = vst.msk [vmem:[%s2268_s28 + $0x4] sm:$0xf] %vm531_vm2, %v797_v18  ;;  %1529 = vst.msk [vmem:[%s2284_s12 + $0x4] sm:$0xf] %vm531_vm2, %v865_v19 }
 0x24a   : > { %v927_v24 = vpop.f32.mrb[12].mxu0  ;;  %v996_v25 = vpop.f32.mrb[12].mxu1 }
 0x24b   : > { %v928_v26 = vadd.f32 %v1535_v22, %v927_v24  ;;  %v997_v27 = vadd.f32 %v1545_v23, %v996_v25  ;;  %v1694_v28 = vpop.f32.mrb[13].mxu0  ;;  %v1702_v29 = vpop.f32.mrb[13].mxu1 }
 0x24c   : > { %v930_v30 = vpop.f32.mrb[14].mxu0  ;;  %v999_v31 = vpop.f32.mrb[14].mxu1 }
 0x24d   : > { %v933_v32 = vmul.f32 0.35355338, %v928_v26  ;;  %v1002_v33 = vpack.c.bf16 %v997_v27, %v997_v27  ;;  %v1695_v34 = vpop.f32.mrb[15].mxu0  ;;  %v1703_v35 = vpop.f32.mrb[15].mxu1 }
 0x24f   : > { %v934_v36 = vpack.c.bf16 %v933_v32, %v933_v32  ;;  %1549 = vst.msk [vmem:[%s2268_s28 + $0x8] sm:$0xf] %vm531_vm2, %v1002_v33 }
 0x251   : > { %1539 = vst.msk [vmem:[%s2279_s24 + $0x8] sm:$0xf] %vm531_vm2, %v934_v36 }
 0x252   : > { %v1064_v39 = vpop.f32.mrb[16].mxu0  ;;  %v1132_v40 = vpop.f32.mrb[16].mxu1 }
 0x253   : > { %v1065_v41 = vadd.f32 %v1555_v37, %v1064_v39  ;;  %v1133_v42 = vadd.f32 %v1565_v38, %v1132_v40  ;;  %v1710_v43 = vpop.f32.mrb[17].mxu0  ;;  %v1718_v44 = vpop.f32.mrb[17].mxu1 }
 0x254   : > { %v1067_v45 = vpop.f32.mrb[18].mxu0  ;;  %v1135_v46 = vpop.f32.mrb[18].mxu1 }
 0x255   : > { %v1070_v47 = vpack.c.bf16 %v1065_v41, %v1065_v41  ;;  %v1138_v48 = vmul.f32 0.35355338, %v1133_v42  ;;  %v1711_v49 = vpop.f32.mrb[19].mxu0  ;;  %v1719_v50 = vpop.f32.mrb[19].mxu1 }
 0x257   : > { %1559 = vst.msk [vmem:[%s2284_s12 + $0x8] sm:$0xf] %vm531_vm2, %v1070_v47  ;;  %v1139_v51 = vpack.c.bf16 %v1138_v48, %v1138_v48 }
 0x259   : > { %1569 = vst.msk [vmem:[%s2279_s24 + $0xc] sm:$0xf] %vm531_vm2, %v1139_v51 }
 0x25a   : > { %v1201_v54 = vpop.f32.mrb[20].mxu0  ;;  %v1269_v55 = vpop.f32.mrb[20].mxu1 }
 0x25b   : > { %1844 = shalt.err (!%p1841_p5)
}
 0x25c   : > { %s1845_s3 = scalar_lea.hbm %s2328_s14, 256  ;;  %s1849_s13 = scalar_lea.hbm %s2481_s9, 512 }
 0x25d   : > { %p1846_p6 = scmp.ne.s32.totalorder %s2328_s14, %s1845_s3  ;;  %p1850_p10 = scmp.lt.u32.totalorder %s2328_s14, %s2481_s9 }
 0x25e   : > { %p1851_p11 = scmp.lt.u32.totalorder %s1849_s13, %s1845_s3  ;;  %p1853_p13 = scmp.lt.u32.totalorder %s1845_s3, %s2328_s14 }
 0x25f   : > { %p1847_p7 = pnand %p1846_p6, %p2080_p4 }
 0x260   : > { %p1852_p12 = por %p1851_p11, %p1850_p10 }
 0x261   : > { %p1848_p9 = pneg %p1847_p7 }
 0x262   : > { %p1854_p0 = por %p1853_p13, %p1852_p12 }
 0x264   : > { %p1855_p1 = pnand %p1854_p0, %p1848_p9 }
 0x266   : > { %1858 = shalt.err (!%p1855_p1)
}
 0x267   : > { %s2487_s5 = smov 64   ;;  %s1975_s1 = smov 4   ;;  %v1202_v56 = vadd.f32 %v1575_v52, %v1201_v54  ;;  %v1270_v57 = vadd.f32 %v1585_v53, %v1269_v55  ;;  %v1726_v58 = vpop.f32.mrb[21].mxu0  ;;  %v1734_v59 = vpop.f32.mrb[21].mxu1 }
 0x268   : > { %1736 = dma.vmem_to_hbm [thread:$0]  (%p2080_p4), %s2320_s15, 256, %s2328_s14, %s2345_s26, %s2487_s5, %s2487_s5, %s1975_s1   ;;  %v1204_v60 = vpop.f32.mrb[22].mxu0  ;;  %v1272_v61 = vpop.f32.mrb[22].mxu1 }
 0x269   : > { %s1337_s3 = sshll.u32 %s2284_s12, 4  ;;  %v1207_v62 = vpack.c.bf16 %v1202_v56, %v1202_v56  ;;  %v1275_v63 = vpack.c.bf16 %v1270_v57, %v1270_v57  ;;  %v1727_v0 = vpop.f32.mrb[23].mxu0  ;;  %v1735_v1 = vpop.f32.mrb[23].mxu1  ;;  %s2381_s26 = scalar_lea.hbm %s2482_s10, %s2318_s16  ;;  %s2383_s3 = int_to_ptr.vmem [resolvable:$true] %s1337_s3 }
 0x26a   : > { %s2389_s13 = scalar_lea.hbm %s2483_s11, %s2318_s16  ;;  %s1284_s23 = scalar_lea.sflag [#allocation5], %s2341_s4 }
 0x26b   : > { %1579 = vst.msk [vmem:[%s2268_s28 + $0xc] sm:$0xf] %vm531_vm2, %v1207_v62  ;;  %1589 = vst.msk [vmem:[%s2284_s12 + $0xc] sm:$0xf] %vm531_vm2, %v1275_v63  ;;  %s1859_s0 = scalar_lea.vmem %s2375_s2, 256  ;;  %s1976_s15 = smov [#allocation4]  }
 0x26c   : > { %p1860_p2 = scmp.ne.s32.totalorder %s2375_s2, %s1859_s0  ;;  %s1863_s14 = sshll.u32 %s1976_s15, 4  ;;  %s1864_s14 = int_to_ptr.vmem [resolvable:$false] %s1863_s14 }
 0x26d   : > { %s1865_s5 = scalar_lea.vmem %s1864_s14, 512  ;;  %p1866_p6 = scmp.lt.s32.totalorder %s2375_s2, %s1864_s14 }
 0x26e   : > { %p1861_p3 = pnand %p1860_p2, %p2080_p4  ;;  %p1867_p7 = scmp.lt.s32.totalorder %s1865_s5, %s1859_s0 }
 0x270   : > { %p1862_p5 = pneg %p1861_p3  ;;  %p1868_p9 = por %p1867_p7, %p1866_p6 }
 0x272   : > { %p1869_p10 = pnand %p1868_p9, %p1862_p5 }
 0x274   : > { %1872 = shalt.err (!%p1869_p10)
}
 0x275   : > { %s1873_s28 = scalar_lea.hbm %s2381_s26, 256  ;;  %s1877_s24 = scalar_lea.hbm %s2482_s10, 512 }
 0x276   : > { %p1874_p11 = scmp.ne.s32.totalorder %s2381_s26, %s1873_s28  ;;  %p1878_p0 = scmp.lt.u32.totalorder %s2381_s26, %s2482_s10 }
 0x277   : > { %p1879_p1 = scmp.lt.u32.totalorder %s1877_s24, %s1873_s28  ;;  %p1881_p3 = scmp.lt.u32.totalorder %s1873_s28, %s2381_s26 }
 0x278   : > { %p1875_p12 = pnand %p1874_p11, %p2080_p4 }
 0x279   : > { %p1880_p2 = por %p1879_p1, %p1878_p0 }
 0x27a   : > { %p1876_p13 = pneg %p1875_p12 }
 0x27b   : > { %p1882_p5 = por %p1881_p3, %p1880_p2 }
 0x27d   : > { %p1883_p6 = pnand %p1882_p5, %p1876_p13 }
 0x27f   : > { %1886 = shalt.err (!%p1883_p6)
}
 0x280   : > { %s2505_s5 = smov 64   ;;  %s1887_s0 = scalar_lea.vmem %s2383_s3, 256 }
 0x281   : > { %1737 = dma.vmem_to_hbm [thread:$0]  (%p2080_p4), %s2375_s2, 256, %s2381_s26, %s1284_s23, %s2505_s5, %s2505_s5, %s1975_s1  }
 0x282   : > { %p1888_p7 = scmp.ne.s32.totalorder %s2383_s3, %s1887_s0  ;;  %s1977_s14 = smov [#allocation6]  }
 0x283   : > { %s1891_s28 = sshll.u32 %s1977_s14, 4  ;;  %s1892_s28 = int_to_ptr.vmem [resolvable:$false] %s1891_s28 }
 0x284   : > { %p1889_p9 = pnand %p1888_p7, %p2080_p4  ;;  %s1893_s12 = scalar_lea.vmem %s1892_s28, 512 }
 0x285   : > { %p1894_p11 = scmp.lt.s32.totalorder %s2383_s3, %s1892_s28  ;;  %p1895_p12 = scmp.lt.s32.totalorder %s1893_s12, %s1887_s0 }
 0x286   : > { %p1890_p10 = pneg %p1889_p9 }
 0x287   : > { %p1896_p13 = por %p1895_p12, %p1894_p11 }
 0x289   : > { %p1897_p0 = pnand %p1896_p13, %p1890_p10 }
 0x28b   : > { %1900 = shalt.err (!%p1897_p0)
}
 0x28c   : > { %s1901_s2 = scalar_lea.hbm %s2389_s13, 256  ;;  %s1905_s24 = scalar_lea.hbm %s2483_s11, 512 }
 0x28d   : > { %p1902_p1 = scmp.ne.s32.totalorder %s2389_s13, %s1901_s2  ;;  %p1906_p5 = scmp.lt.u32.totalorder %s2389_s13, %s2483_s11 }
 0x28e   : > { %p1907_p6 = scmp.lt.u32.totalorder %s1905_s24, %s1901_s2  ;;  %p1909_p9 = scmp.lt.u32.totalorder %s1901_s2, %s2389_s13 }
 0x28f   : > { %p1903_p2 = pnand %p1902_p1, %p2080_p4 }
 0x290   : > { %p1908_p7 = por %p1907_p6, %p1906_p5 }
 0x291   : > { %p1904_p3 = pneg %p1903_p2 }
 0x292   : > { %p1910_p10 = por %p1909_p9, %p1908_p7 }
 0x294   : > { %p1911_p11 = pnand %p1910_p10, %p1904_p3 }
 0x296   : > { %1914 = shalt.err (!%p1911_p11)
}
 0x297   : > { %1738 = dma.vmem_to_hbm [thread:$0]  (%p2080_p4), %s2383_s3, 256, %s2389_s13, %s1284_s23, %s2505_s5, %s2505_s5, %s1975_s1  }
 0x298 PF: > { %p1752_p12 = scmp.ge.s32.totalorder %s1969_s22, 2  ;;  %s1352_s0 = sand.u32 1, %s1949_s17  }
 0x299   : > { %s1353_s14 = scalar_lea.sflag [#allocation3], %s1352_s0 }
 0x29a   : > { %p1743_p13 = pnand %p1752_p12, %p2089_p8 }
 0x29c   : > { %1940 = dma.done.wait (!%p1743_p13), %s1353_s14, 256  }
 0x29d   : > { %1942 = vsyncadd (!%p1743_p13), %s1353_s14, 4294967040  ;;  %s2506_s27 = sadd.s32 4294967294, %s1969_s22  }
 0x29e   : > { %s1361_s28 = sand.u32 1, %s2506_s27  }
 0x29f   : > { %s1362_s12 = scalar_lea.sflag [#allocation5], %s1361_s28 }
 0x2a0   : > { %1944 = dma.done.wait (!%p1743_p13), %s1362_s12, 512  }
 0x2a1   : > { %1946 = vsyncadd (!%p1743_p13), %s1362_s12, 4294966784  ;;  %s28_s22 = sadd.s32 1, %s1969_s22   ;;  %s2507_s17 = smov %s1953_s18 }
 0x2a2   : > { %p25_p4 = scmp.ge.s32.totalorder %s28_s22, 4   ;;  %s2508_s18 = smov %s1957_s19 }
 0x2a3   : > { %s2509_s19 = smov %s2095_s30  ;;  %s2510_s20 = smov %s1965_s21 }
 0x2a4   : > { %s2511_s21 = smov %s2513_s25  ;;  %27 = sbr.rel (!%p25_p4) target bundleno = 13 (0xd), region = 150 }
 0x2ab   :  { %1376 = vsyncpa [#allocation3], 1 }
 0x2ac   :  { %1378 = vsyncpa [#allocation3 + $0x1], 1 }
 0x2ad   :  { %1379 = vsyncpa [#allocation5], 1 }
 0x2ae   :  { %1381 = vsyncpa [#allocation5 + $0x1], 1 }

// kernel: tpu_custom_call.1
= control target key start
LH: loop header
LB: loop body
LE: loop exit
PB: predicated region body
PF: predicated region fallthrough
CT: control target
= control target key end

     0   :  { %s2472_s0 = inlined_call_operand.vmem [shape: f32[2,8,32], index: 0, kind: input, shape index: {}]   ;;  %s2473_s1 = inlined_call_operand.vmem [shape: f32[1,32], index: 1, kind: input, shape index: {}]   ;;  %s2474_s2 = inlined_call_operand.vmem [shape: f32[1,32], index: 2, kind: input, shape index: {}]   ;;  %s2475_s3 = inlined_call_operand.vmem [shape: bf16[4,32,8], index: 3, kind: input, shape index: {}]   ;;  %s2476_s4 = inlined_call_operand.vmem [shape: f32[4,1,8], index: 4, kind: input, shape index: {}]   ;;  %s2477_s5 = inlined_call_operand.vmem [shape: bf16[4,32,8], index: 5, kind: input, shape index: {}]   ;;  %s2478_s6 = inlined_call_operand.vmem [shape: f32[4,1,8], index: 6, kind: input, shape index: {}]   ;;  %s2479_s7 = inlined_call_operand.vmem [shape: bf16[4,32,8], index: 7, kind: input, shape index: {}]   ;;  %s2480_s8 = inlined_call_operand.vmem [shape: f32[4,1,8], index: 8, kind: input, shape index: {}]   ;;  %s2481_s9 = inlined_call_operand.hbm [shape: bf16[2,4,8,8], index: 9, kind: output, shape index: {0}]   ;;  %s2482_s10 = inlined_call_operand.hbm [shape: bf16[2,4,8,8], index: 10, kind: output, shape index: {1}]   ;;  %s2483_s11 = inlined_call_operand.hbm [shape: bf16[2,4,8,8], index: 11, kind: output, shape index: {2}]  }
   0x1   :  { %2489 = sst [smem:[#allocation9_spill]] %s2472_s0 }
   0x2   :  { %2490 = sst [smem:[#allocation10_spill]] %s2473_s1 }
   0x3   :  { %2491 = sst [smem:[#allocation11_spill]] %s2474_s2 }
   0x4   :  { %2492 = sst [smem:[#allocation12_spill]] %s2475_s3 }
   0x5   :  { %2493 = sst [smem:[#allocation13_spill]] %s2476_s4 }
   0x6   :  { %2494 = sst [smem:[#allocation14_spill]] %s2477_s5 }
   0x7   :  { %17 = vsyncpa [#allocation3], 0 }
   0x8   :  { %19 = vsyncpa [#allocation3 + $0x1], 0 }
   0x9   :  { %20 = vsyncpa [#allocation5], 0 }
   0xa   :  { %22 = vsyncpa [#allocation5 + $0x1], 0  ;;  %s2038_s17 = smov 0   ;;  %s2040_s18 = smov 0  }
   0xb   :  { %s2042_s19 = smov 0   ;;  %s2044_s20 = smov 0  }
   0xc   :  { %s2046_s21 = smov 0   ;;  %s2048_s22 = smov 0  }
   0xd LB: > { %s2486_s23 = sadd.s32 4294967295, %s1969_s22   ;;  %s2484_s24 = sadd.s32 4294967294, %s1969_s22   ;;  %s1969_s22 = sphi %s2048_s22, %s28_s22   ;;  %s1965_s21 = sphi %s2046_s21, %s2511_s21   ;;  %s1961_s20 = sphi %s2044_s20, %s2510_s20   ;;  %s1957_s19 = sphi %s2042_s19, %s2509_s19   ;;  %s1953_s18 = sphi %s2040_s18, %s2508_s18   ;;  %s1949_s17 = sphi %s2038_s17, %s2507_s17  }
   0xe   : > { %s40_s25 = sadd.s32 1, %s1965_s21  ;;  %s245_s26 = sadd.s32 1, %s1957_s19 }
   0xf   : > { %p42_p0 = scmp.ge.s32.totalorder %s40_s25, 2  ;;  %p255_p1 = scmp.ne.s32.totalorder %s1957_s19, %s1953_s18 }
  0x10   : > { %p256_p2 = scmp.eq.s32.totalorder %s2486_s23, 1  ;;  %p261_p3 = scmp.ne.s32.totalorder %s1953_s18, %s1949_s17 }
  0x11   : > { %s2513_s25 = smov (%p42_p0, %s40_s25), 0  ;;  %p262_p5 = scmp.eq.s32.totalorder %s2484_s24, 1 }
  0x12   : > { %p2080_p4 = por %p256_p2, %p255_p1  ;;  %s240_s28 = ssub.s32 %s1965_s21, %s2513_s25 }
  0x13   : > { %p1481_p6 = scmp.ge.s32.totalorder %s1969_s22, 1  ;;  %p243_p7 = scmp.eq.s32.totalorder %s240_s28, 0 }
  0x14   : > { %p2089_p8 = por %p262_p5, %p261_p3  ;;  %p370_p9 = scmp.lt.s32.totalorder %s1969_s22, 3 }
  0x15   : > { %s2095_s30 = scalar_select %p243_p7, %s1957_s19, %s245_s26  }
  0x16   : > { %p371_p10 = pnand %p1481_p6, %p370_p9 }
  0x17   : > { %p422_p11 = scmp.lt.s32.totalorder (!%p371_p10), %s1961_s20, 1  ;;  %vm433_vm0 = vcmask (!%p371_p10), 261120   ;;  %s2497_s0 = sld [smem:[#allocation9_spill]] (!%p371_p10)  ;;  %v1971_v9 = vmov (!%p371_p10), 0.0   ;;  %vm1972_vm1 = vmmov (!%p371_p10), 0   ;;  %v1809_v21 = vld [vmem:[%s2479_s7] sm:$0xff] (!%p371_p10)  }
  0x18   : > { %374 = sbr.rel (%p371_p10) target bundleno = 664 (0x298), region = 56  ;;  %s2498_s3 = sld [smem:[#allocation12_spill]] (!%p371_p10)  ;;  %1640 = vmatprep.subr.bf16.mxu0 (!%p371_p10), %v1971_v9  ;;  %1648 = vmatprep.subr.bf16.mxu1 (!%p371_p10), %v1971_v9  ;;  %v1811_v24 = vld [vmem:[%s2479_s7 + $0x8] sm:$0xff] (!%p371_p10)   ;;  %v1814_v27 = vld [vmem:[%s2479_s7 + $0x10] sm:$0xff] (!%p371_p10)   ;;  %v1816_v29 = vld [vmem:[%s2479_s7 + $0x18] sm:$0xff] (!%p371_p10)   ;;  %vm531_vm2 = vcmask (!%p371_p10), 60416  }
  0x19   : > { %s2499_s5 = sld [smem:[#allocation14_spill]] (!%p371_p10)  ;;  %1644 = vmatprep.mubr.msk.bf16.mxu0 (!%p371_p10), %vm1972_vm1, %v1971_v9  ;;  %1652 = vmatprep.mubr.msk.bf16.mxu1 (!%p371_p10), %vm1972_vm1, %v1971_v9  ;;  %s2500_s1 = sld [smem:[#allocation10_spill]] (!%p371_p10)  ;;  %v1821_v34 = vld [vmem:[%s2479_s7 + $0x20] sm:$0xff] (!%p371_p10)   ;;  %v1823_v36 = vld [vmem:[%s2479_s7 + $0x28] sm:$0xff] (!%p371_p10)   ;;  %v1826_v39 = vld [vmem:[%s2479_s7 + $0x30] sm:$0xff] (!%p371_p10)  }
  0x1a   : > { %s2501_s2 = sld [smem:[#allocation11_spill]] (!%p371_p10)  ;;  %v1828_v41 = vld [vmem:[%s2479_s7 + $0x38] sm:$0xff] (!%p371_p10)   ;;  %s2502_s4 = sld [smem:[#allocation13_spill]] (!%p371_p10)  ;;  %v1492_v43 = vld [vmem:[%s2478_s6] ss:$0 sm:$0xff] (!%p371_p10) }
  0x1b   : > { %v1496_v57 = vld [vmem:[%s2480_s8] ss:$0 sm:$0xff] (!%p371_p10)  ;;  %s1973_s23 = smov (!%p371_p10), [#allocation2]  }
  0x1e   : > { %v1805_v7 = vld [vmem:[%s2498_s3] sm:$0xff] (!%p371_p10)   ;;  %v1807_v10 = vld [vmem:[%s2498_s3 + $0x8] sm:$0xff] (!%p371_p10)   ;;  %v1810_v22 = vld [vmem:[%s2498_s3 + $0x10] sm:$0xff] (!%p371_p10)  }
  0x1f   : > { %s423_s12 = scalar_select %p422_p11, %s1961_s20, 1  ;;  %v1806_v8 = vld [vmem:[%s2499_s5] sm:$0xff]   ;;  %1641 = vmatpush3.bf16.msra.mxu0 %v1805_v7  ;;  %v1808_v11 = vld [vmem:[%s2499_s5 + $0x8] sm:$0xff]   ;;  %v1812_v25 = vld [vmem:[%s2498_s3 + $0x18] sm:$0xff]  }
  0x20   : > { %1649 = vmatpush3.bf16.msra.mxu1 %v1806_v8  ;;  %1642 = vmatprep.subr.bf16.mxu0 %v1971_v9  ;;  %v1486_v16 = vld [vmem:[%s2500_s1] ss:$0 sm:$0xff]  ;;  %v1813_v26 = vld [vmem:[%s2499_s5 + $0x10] sm:$0xff]   ;;  %v1815_v28 = vld [vmem:[%s2499_s5 + $0x18] sm:$0xff]  }
  0x21   : > { %s1485_s13 = sshll.u32 %s423_s12, 3  ;;  %1650 = vmatprep.subr.bf16.mxu1 %v1971_v9  ;;  %v1487_v18 = vld [vmem:[%s2501_s2] ss:$0 sm:$0xff]  ;;  %v1819_v32 = vld [vmem:[%s2498_s3 + $0x28] sm:$0xff]   ;;  %v1822_v35 = vld [vmem:[%s2498_s3 + $0x30] sm:$0xff]  }
  0x22   : > { %s428_s16 = scalar_lea.vmem %s2497_s0, %s1485_s13  ;;  %v1817_v30 = vld [vmem:[%s2498_s3 + $0x20] sm:$0xff]   ;;  %v1820_v33 = vld [vmem:[%s2499_s5 + $0x28] sm:$0xff]   ;;  %v1824_v37 = vld [vmem:[%s2498_s3 + $0x38] sm:$0xff]   ;;  %s2485_s13 = sand.u32 1, %s1953_s18  }
  0x23   : > { %v430_v0 = vld [vmem:[%s428_s16] sm:$0xff]  ;;  %1643 = vmatpush3.bf16.msra.mxu0 %v1807_v10  ;;  %v1825_v38 = vld [vmem:[%s2499_s5 + $0x30] sm:$0xff]   ;;  %v1827_v40 = vld [vmem:[%s2499_s5 + $0x38] sm:$0xff]   ;;  %s2265_s26 = sshll.u32 %s2485_s13, 4  ;;  %s2318_s16 = sshll.u32 %s1961_s20, 8 }
  0x24   : > { %v434_v1 = vsel %vm433_vm0, %v430_v0, 0.0  ;;  %1651 = vmatpush3.bf16.msra.mxu1 %v1808_v11  ;;  %1656 = vmatprep.subr.bf16.mxu0 %v1971_v9  ;;  %v1818_v31 = vld [vmem:[%s2499_s5 + $0x20] sm:$0xff]   ;;  %s2268_s28 = scalar_lea.vmem [#allocation4], %s2265_s26  ;;  %s2279_s24 = scalar_lea.vmem [#allocation2], %s2265_s26 }
  0x25   : > { %435 = vadd.xlane.f32.xlu0 %v434_v1  ;;  %1664 = vmatprep.subr.bf16.mxu1 %v1971_v9  ;;  %v1488_v42 = vld [vmem:[%s2502_s4] ss:$0 sm:$0xff]  ;;  %v1505_v58 = vld [vmem:[%s2502_s4 + $0x1] ss:$0 sm:$0xff]  ;;  %s2284_s12 = scalar_lea.vmem [#allocation6], %s2265_s26  ;;  %s1303_s15 = sshll.u32 %s2279_s24, 4  ;;  %s2320_s15 = int_to_ptr.vmem [resolvable:$true] %s1303_s15 }
  0x26   : > { %v1515_v8 = vld [vmem:[%s2478_s6 + $0x1] ss:$0 sm:$0xff]  ;;  %s2328_s14 = scalar_lea.hbm %s2481_s9, %s2318_s16  ;;  %s1320_s2 = sshll.u32 %s2268_s28, 4  ;;  %s2375_s2 = int_to_ptr.vmem [resolvable:$true] %s1320_s2 }
  0x27   : > { %s2503_s3 = sadd.s32 4294967295, %s1969_s22   ;;  %s2504_s13 = sand.u32 1, %s1953_s18  }
  0x28   : > { %s2345_s26 = scalar_lea.sflag [#allocation3], %s2504_s13  ;;  %s1831_s5 = scalar_lea.vmem %s2320_s15, 256 }
  0x29   : > { %p1832_p12 = scmp.ne.s32.totalorder %s2320_s15, %s1831_s5  ;;  %s1835_s0 = sshll.u32 %s1973_s23, 4  ;;  %s1836_s0 = int_to_ptr.vmem [resolvable:$false] %s1835_s0 }
  0x2a   : > { %s1837_s1 = scalar_lea.vmem %s1836_s0, 512  ;;  %p1838_p1 = scmp.lt.s32.totalorder %s2320_s15, %s1836_s0 }
  0x2b   : > { %p1833_p13 = pnand %p1832_p12, %p2080_p4  ;;  %p1839_p2 = scmp.lt.s32.totalorder %s1837_s1, %s1831_s5 }
  0x2d   : > { %p1834_p0 = pneg %p1833_p13  ;;  %p1840_p3 = por %p1839_p2, %p1838_p1 }
  0x2f   : > { %p1841_p5 = pnand %p1840_p3, %p1834_p0 }
  0xb2   : > { %v436_v2 = vpop.xlane.xlu0 %435 }
  0xb3   : > { %v438_v3 = vmul.f32 0.03125, %v436_v2 }
  0xb5   : > { %v439_v4 = vsub.f32 %v430_v0, %v438_v3 }
  0xb7   : > { %v440_v5 = vmul.f32 %v439_v4, %v439_v4 }
  0xb9   : > { %v441_v6 = vsel %vm433_vm0, %v440_v5, 0.0 }
  0xba   : > { %442 = vadd.xlane.f32.xlu0 %v441_v6 }
 0x147   : > { %v443_v12 = vpop.xlane.xlu0 %442 }
 0x148   : > { %v444_v13 = vmul.f32 0.03125, %v443_v12 }
 0x14a   : > { %v445_v14 = vadd.f32 1e-05, %v444_v13 }
 0x14c   : > { %1829 = vrsqrt.f32 %v445_v14 }
 0x156   : > { %v1830_v15 = vpop.eup %1829 }
 0x157   : > { %v447_v17 = vmul.f32 %v1830_v15, %v439_v4 }
 0x159   : > { %v454_v19 = vmul.f32 %v1486_v16, %v447_v17 }
 0x15b   : > { %v461_v20 = vadd.f32 %v1487_v18, %v454_v19 }
 0x15d   : > { %v2138_v23 = vpack.c.bf16 %v461_v20, %v461_v20 }
 0x15f   : > { %1645 = vmatmul.mubr.msk.bf16.vlgmr.msra.gmra.mrb[0].mxu0 %vm433_vm0, %v2138_v23  ;;  %1653 = vmatmul.mubr.msk.bf16.vlgmr.msra.gmra.mrb[0].mxu1 %vm433_vm0, %v2138_v23 }
 0x160   : > { %1657 = vmatpush3.bf16.msra.mxu0 %v1809_v21  ;;  %1665 = vmatpush3.bf16.msra.mxu1 %v1810_v22  ;;  %v1535_v22 = vld [vmem:[%s2502_s4 + $0x2] ss:$0 sm:$0xff] }
 0x161   : > { %1658 = vmatprep.subr.bf16.mxu0 %v1971_v9  ;;  %1666 = vmatprep.subr.bf16.mxu1 %v1971_v9 }
 0x162   : > { %1660 = vmatprep.mubr.msk.bf16.mxu0 %vm1972_vm1, %v1971_v9  ;;  %1668 = vmatprep.mubr.msk.bf16.mxu1 %vm1972_vm1, %v1971_v9 }
 0x164   : > { %1659 = vmatpush3.bf16.msra.mxu0 %v1811_v24  ;;  %1667 = vmatpush3.bf16.msra.mxu1 %v1812_v25 }
 0x165   : > { %1672 = vmatprep.subr.bf16.mxu0 %v1971_v9  ;;  %1680 = vmatprep.subr.bf16.mxu1 %v1971_v9 }
 0x167   : > { %1661 = vmatmul.mubr.msk.bf16.vlgmr.msra.gmra.mrb[4].mxu0 %vm433_vm0, %v2138_v23  ;;  %1669 = vmatmul.mubr.msk.bf16.vlgmr.msra.gmra.mrb[4].mxu1 %vm433_vm0, %v2138_v23 }
 0x168   : > { %1673 = vmatpush3.bf16.msra.mxu0 %v1813_v26  ;;  %1681 = vmatpush3.bf16.msra.mxu1 %v1814_v27 }
 0x169   : > { %1674 = vmatprep.subr.bf16.mxu0 %v1971_v9  ;;  %1682 = vmatprep.subr.bf16.mxu1 %v1971_v9 }
 0x16a   : > { %1676 = vmatprep.mubr.msk.bf16.mxu0 %vm1972_vm1, %v1971_v9  ;;  %1684 = vmatprep.mubr.msk.bf16.mxu1 %vm1972_vm1, %v1971_v9 }
 0x16c   : > { %1675 = vmatpush3.bf16.msra.mxu0 %v1815_v28  ;;  %1683 = vmatpush3.bf16.msra.mxu1 %v1816_v29 }
 0x16d   : > { %1688 = vmatprep.subr.bf16.mxu0 %v1971_v9  ;;  %1696 = vmatprep.subr.bf16.mxu1 %v1971_v9 }
 0x16f   : > { %1677 = vmatmul.mubr.msk.bf16.vlgmr.msra.gmra.mrb[8].mxu0 %vm433_vm0, %v2138_v23  ;;  %1685 = vmatmul.mubr.msk.bf16.vlgmr.msra.gmra.mrb[8].mxu1 %vm433_vm0, %v2138_v23 }
 0x170   : > { %1689 = vmatpush3.bf16.msra.mxu0 %v1817_v30  ;;  %1697 = vmatpush3.bf16.msra.mxu1 %v1818_v31 }
 0x171   : > { %1690 = vmatprep.subr.bf16.mxu0 %v1971_v9  ;;  %1698 = vmatprep.subr.bf16.mxu1 %v1971_v9 }
 0x172   : > { %1692 = vmatprep.mubr.msk.bf16.mxu0 %vm1972_vm1, %v1971_v9  ;;  %1700 = vmatprep.mubr.msk.bf16.mxu1 %vm1972_vm1, %v1971_v9 }
 0x174   : > { %1691 = vmatpush3.bf16.msra.mxu0 %v1819_v32  ;;  %1699 = vmatpush3.bf16.msra.mxu1 %v1820_v33 }
 0x175   : > { %1704 = vmatprep.subr.bf16.mxu0 %v1971_v9  ;;  %1712 = vmatprep.subr.bf16.mxu1 %v1971_v9 }
 0x177   : > { %1693 = vmatmul.mubr.msk.bf16.vlgmr.msra.gmra.mrb[12].mxu0 %vm433_vm0, %v2138_v23  ;;  %1701 = vmatmul.mubr.msk.bf16.vlgmr.msra.gmra.mrb[12].mxu1 %vm433_vm0, %v2138_v23 }
 0x178   : > { %1705 = vmatpush3.bf16.msra.mxu0 %v1821_v34  ;;  %1713 = vmatpush3.bf16.msra.mxu1 %v1822_v35 }
 0x179   : > { %1706 = vmatprep.subr.bf16.mxu0 %v1971_v9  ;;  %1714 = vmatprep.subr.bf16.mxu1 %v1971_v9 }
 0x17a   : > { %1708 = vmatprep.mubr.msk.bf16.mxu0 %vm1972_vm1, %v1971_v9  ;;  %1716 = vmatprep.mubr.msk.bf16.mxu1 %vm1972_vm1, %v1971_v9 }
 0x17c   : > { %1707 = vmatpush3.bf16.msra.mxu0 %v1823_v36  ;;  %1715 = vmatpush3.bf16.msra.mxu1 %v1824_v37  ;;  %v1555_v37 = vld [vmem:[%s2480_s8 + $0x2] ss:$0 sm:$0xff] }
 0x17d   : > { %1720 = vmatprep.subr.bf16.mxu0 %v1971_v9  ;;  %1728 = vmatprep.subr.bf16.mxu1 %v1971_v9 }
 0x17f   : > { %1709 = vmatmul.mubr.msk.bf16.vlgmr.msra.gmra.mrb[16].mxu0 %vm433_vm0, %v2138_v23  ;;  %1717 = vmatmul.mubr.msk.bf16.vlgmr.msra.gmra.mrb[16].mxu1 %vm433_vm0, %v2138_v23 }
 0x180   : > { %1721 = vmatpush3.bf16.msra.mxu0 %v1825_v38  ;;  %1729 = vmatpush3.bf16.msra.mxu1 %v1826_v39  ;;  %v1565_v38 = vld [vmem:[%s2502_s4 + $0x3] ss:$0 sm:$0xff]  ;;  %s2341_s4 = sand.u32 1, %s2503_s3  }
 0x181   : > { %1722 = vmatprep.subr.bf16.mxu0 %v1971_v9  ;;  %1730 = vmatprep.subr.bf16.mxu1 %v1971_v9 }
 0x182   : > { %1724 = vmatprep.mubr.msk.bf16.mxu0 %vm1972_vm1, %v1971_v9  ;;  %1732 = vmatprep.mubr.msk.bf16.mxu1 %vm1972_vm1, %v1971_v9  ;;  %v1525_v9 = vld [vmem:[%s2480_s8 + $0x1] ss:$0 sm:$0xff] }
 0x184   : > { %1723 = vmatpush3.bf16.msra.mxu0 %v1827_v40  ;;  %1731 = vmatpush3.bf16.msra.mxu1 %v1828_v41 }
 0x187   : > { %1725 = vmatmul.mubr.msk.bf16.vlgmr.msra.gmra.mrb[20].mxu0 %vm433_vm0, %v2138_v23  ;;  %1733 = vmatmul.mubr.msk.bf16.vlgmr.msra.gmra.mrb[20].mxu1 %vm433_vm0, %v2138_v23  ;;  %v1545_v23 = vld [vmem:[%s2478_s6 + $0x2] ss:$0 sm:$0xff] }
 0x232   : > { %v523_v44 = vpop.f32.mrb[0].mxu0  ;;  %v590_v45 = vpop.f32.mrb[0].mxu1 }
 0x233   : > { %v524_v46 = vadd.f32 %v1488_v42, %v523_v44  ;;  %v591_v47 = vadd.f32 %v1492_v43, %v590_v45  ;;  %v1646_v48 = vpop.f32.mrb[1].mxu0  ;;  %v1654_v49 = vpop.f32.mrb[1].mxu1 }
 0x234   : > { %v526_v50 = vpop.f32.mrb[2].mxu0  ;;  %v593_v51 = vpop.f32.mrb[2].mxu1 }
 0x235   : > { %v529_v52 = vmul.f32 0.35355338, %v524_v46  ;;  %v596_v53 = vpack.c.bf16 %v591_v47, %v591_v47  ;;  %v1647_v54 = vpop.f32.mrb[3].mxu0  ;;  %v1655_v55 = vpop.f32.mrb[3].mxu1 }
 0x237   : > { %v530_v56 = vpack.c.bf16 %v529_v52, %v529_v52  ;;  %597 = vst.msk [vmem:[%s2268_s28] sm:$0xf] %vm531_vm2, %v596_v53  ;;  %v1575_v52 = vld [vmem:[%s2478_s6 + $0x3] ss:$0 sm:$0xff] }
 0x238   : > { %v1585_v53 = vld [vmem:[%s2480_s8 + $0x3] ss:$0 sm:$0xff] }
 0x239   : > { %532 = vst.msk [vmem:[%s2279_s24] sm:$0xf] %vm531_vm2, %v530_v56 }
 0x23a   : > { %v655_v59 = vpop.f32.mrb[4].mxu0  ;;  %v722_v60 = vpop.f32.mrb[4].mxu1 }
 0x23b   : > { %v656_v61 = vadd.f32 %v1496_v57, %v655_v59  ;;  %v723_v62 = vadd.f32 %v1505_v58, %v722_v60  ;;  %v1662_v63 = vpop.f32.mrb[5].mxu0  ;;  %v1670_v0 = vpop.f32.mrb[5].mxu1 }
 0x23c   : > { %v658_v1 = vpop.f32.mrb[6].mxu0  ;;  %v725_v2 = vpop.f32.mrb[6].mxu1 }
 0x23d   : > { %v661_v3 = vpack.c.bf16 %v656_v61, %v656_v61  ;;  %v728_v4 = vmul.f32 0.35355338, %v723_v62  ;;  %v1663_v5 = vpop.f32.mrb[7].mxu0  ;;  %v1671_v6 = vpop.f32.mrb[7].mxu1 }
 0x23f   : > { %662 = vst.msk [vmem:[%s2284_s12] sm:$0xf] %vm531_vm2, %v661_v3  ;;  %v729_v7 = vpack.c.bf16 %v728_v4, %v728_v4 }
 0x241   : > { %1509 = vst.msk [vmem:[%s2279_s24 + $0x4] sm:$0xf] %vm531_vm2, %v729_v7 }
 0x242   : > { %v791_v10 = vpop.f32.mrb[8].mxu0  ;;  %v859_v11 = vpop.f32.mrb[8].mxu1 }
 0x243   : > { %v792_v12 = vadd.f32 %v1515_v8, %v791_v10  ;;  %v860_v13 = vadd.f32 %v1525_v9, %v859_v11  ;;  %v1678_v14 = vpop.f32.mrb[9].mxu0  ;;  %v1686_v15 = vpop.f32.mrb[9].mxu1 }
 0x244   : > { %v794_v16 = vpop.f32.mrb[10].mxu0  ;;  %v862_v17 = vpop.f32.mrb[10].mxu1 }
 0x245   : > { %v797_v18 = vpack.c.bf16 %v792_v12, %v792_v12  ;;  %v865_v19 = vpack.c.bf16 %v860_v13, %v860_v13  ;;  %v1679_v20 = vpop.f32.mrb[11].mxu0  ;;  %v1687_v21 = vpop.f32.mrb[11].mxu1 }
 0x247   : > { %1519 = vst.msk [vmem:[%s2268_s28 + $0x4] sm:$0xf] %vm531_vm2, %v797_v18  ;;  %1529 = vst.msk [vmem:[%s2284_s12 + $0x4] sm:$0xf] %vm531_vm2, %v865_v19 }
 0x24a   : > { %v927_v24 = vpop.f32.mrb[12].mxu0  ;;  %v996_v25 = vpop.f32.mrb[12].mxu1 }
 0x24b   : > { %v928_v26 = vadd.f32 %v1535_v22, %v927_v24  ;;  %v997_v27 = vadd.f32 %v1545_v23, %v996_v25  ;;  %v1694_v28 = vpop.f32.mrb[13].mxu0  ;;  %v1702_v29 = vpop.f32.mrb[13].mxu1 }
 0x24c   : > { %v930_v30 = vpop.f32.mrb[14].mxu0  ;;  %v999_v31 = vpop.f32.mrb[14].mxu1 }
 0x24d   : > { %v933_v32 = vmul.f32 0.35355338, %v928_v26  ;;  %v1002_v33 = vpack.c.bf16 %v997_v27, %v997_v27  ;;  %v1695_v34 = vpop.f32.mrb[15].mxu0  ;;  %v1703_v35 = vpop.f32.mrb[15].mxu1 }
 0x24f   : > { %v934_v36 = vpack.c.bf16 %v933_v32, %v933_v32  ;;  %1549 = vst.msk [vmem:[%s2268_s28 + $0x8] sm:$0xf] %vm531_vm2, %v1002_v33 }
 0x251   : > { %1539 = vst.msk [vmem:[%s2279_s24 + $0x8] sm:$0xf] %vm531_vm2, %v934_v36 }
 0x252   : > { %v1064_v39 = vpop.f32.mrb[16].mxu0  ;;  %v1132_v40 = vpop.f32.mrb[16].mxu1 }
 0x253   : > { %v1065_v41 = vadd.f32 %v1555_v37, %v1064_v39  ;;  %v1133_v42 = vadd.f32 %v1565_v38, %v1132_v40  ;;  %v1710_v43 = vpop.f32.mrb[17].mxu0  ;;  %v1718_v44 = vpop.f32.mrb[17].mxu1 }
 0x254   : > { %v1067_v45 = vpop.f32.mrb[18].mxu0  ;;  %v1135_v46 = vpop.f32.mrb[18].mxu1 }
 0x255   : > { %v1070_v47 = vpack.c.bf16 %v1065_v41, %v1065_v41  ;;  %v1138_v48 = vmul.f32 0.35355338, %v1133_v42  ;;  %v1711_v49 = vpop.f32.mrb[19].mxu0  ;;  %v1719_v50 = vpop.f32.mrb[19].mxu1 }
 0x257   : > { %1559 = vst.msk [vmem:[%s2284_s12 + $0x8] sm:$0xf] %vm531_vm2, %v1070_v47  ;;  %v1139_v51 = vpack.c.bf16 %v1138_v48, %v1138_v48 }
 0x259   : > { %1569 = vst.msk [vmem:[%s2279_s24 + $0xc] sm:$0xf] %vm531_vm2, %v1139_v51 }
 0x25a   : > { %v1201_v54 = vpop.f32.mrb[20].mxu0  ;;  %v1269_v55 = vpop.f32.mrb[20].mxu1 }
 0x25b   : > { %1844 = shalt.err (!%p1841_p5)
}
 0x25c   : > { %s1845_s3 = scalar_lea.hbm %s2328_s14, 256  ;;  %s1849_s13 = scalar_lea.hbm %s2481_s9, 512 }
 0x25d   : > { %p1846_p6 = scmp.ne.s32.totalorder %s2328_s14, %s1845_s3  ;;  %p1850_p10 = scmp.lt.u32.totalorder %s2328_s14, %s2481_s9 }
 0x25e   : > { %p1851_p11 = scmp.lt.u32.totalorder %s1849_s13, %s1845_s3  ;;  %p1853_p13 = scmp.lt.u32.totalorder %s1845_s3, %s2328_s14 }
 0x25f   : > { %p1847_p7 = pnand %p1846_p6, %p2080_p4 }
 0x260   : > { %p1852_p12 = por %p1851_p11, %p1850_p10 }
 0x261   : > { %p1848_p9 = pneg %p1847_p7 }
 0x262   : > { %p1854_p0 = por %p1853_p13, %p1852_p12 }
 0x264   : > { %p1855_p1 = pnand %p1854_p0, %p1848_p9 }
 0x266   : > { %1858 = shalt.err (!%p1855_p1)
}
 0x267   : > { %s2487_s5 = smov 64   ;;  %s1975_s1 = smov 4   ;;  %v1202_v56 = vadd.f32 %v1575_v52, %v1201_v54  ;;  %v1270_v57 = vadd.f32 %v1585_v53, %v1269_v55  ;;  %v1726_v58 = vpop.f32.mrb[21].mxu0  ;;  %v1734_v59 = vpop.f32.mrb[21].mxu1 }
 0x268   : > { %1736 = dma.vmem_to_hbm [thread:$0]  (%p2080_p4), %s2320_s15, 256, %s2328_s14, %s2345_s26, %s2487_s5, %s2487_s5, %s1975_s1   ;;  %v1204_v60 = vpop.f32.mrb[22].mxu0  ;;  %v1272_v61 = vpop.f32.mrb[22].mxu1 }
 0x269   : > { %s1337_s3 = sshll.u32 %s2284_s12, 4  ;;  %v1207_v62 = vpack.c.bf16 %v1202_v56, %v1202_v56  ;;  %v1275_v63 = vpack.c.bf16 %v1270_v57, %v1270_v57  ;;  %v1727_v0 = vpop.f32.mrb[23].mxu0  ;;  %v1735_v1 = vpop.f32.mrb[23].mxu1  ;;  %s2381_s26 = scalar_lea.hbm %s2482_s10, %s2318_s16  ;;  %s2383_s3 = int_to_ptr.vmem [resolvable:$true] %s1337_s3 }
 0x26a   : > { %s2389_s13 = scalar_lea.hbm %s2483_s11, %s2318_s16  ;;  %s1284_s23 = scalar_lea.sflag [#allocation5], %s2341_s4 }
 0x26b   : > { %1579 = vst.msk [vmem:[%s2268_s28 + $0xc] sm:$0xf] %vm531_vm2, %v1207_v62  ;;  %1589 = vst.msk [vmem:[%s2284_s12 + $0xc] sm:$0xf] %vm531_vm2, %v1275_v63  ;;  %s1859_s0 = scalar_lea.vmem %s2375_s2, 256  ;;  %s1976_s15 = smov [#allocation4]  }
 0x26c   : > { %p1860_p2 = scmp.ne.s32.totalorder %s2375_s2, %s1859_s0  ;;  %s1863_s14 = sshll.u32 %s1976_s15, 4  ;;  %s1864_s14 = int_to_ptr.vmem [resolvable:$false] %s1863_s14 }
 0x26d   : > { %s1865_s5 = scalar_lea.vmem %s1864_s14, 512  ;;  %p1866_p6 = scmp.lt.s32.totalorder %s2375_s2, %s1864_s14 }
 0x26e   : > { %p1861_p3 = pnand %p1860_p2, %p2080_p4  ;;  %p1867_p7 = scmp.lt.s32.totalorder %s1865_s5, %s1859_s0 }
 0x270   : > { %p1862_p5 = pneg %p1861_p3  ;;  %p1868_p9 = por %p1867_p7, %p1866_p6 }
 0x272   : > { %p1869_p10 = pnand %p1868_p9, %p1862_p5 }
 0x274   : > { %1872 = shalt.err (!%p1869_p10)
}
 0x275   : > { %s1873_s28 = scalar_lea.hbm %s2381_s26, 256  ;;  %s1877_s24 = scalar_lea.hbm %s2482_s10, 512 }
 0x276   : > { %p1874_p11 = scmp.ne.s32.totalorder %s2381_s26, %s1873_s28  ;;  %p1878_p0 = scmp.lt.u32.totalorder %s2381_s26, %s2482_s10 }
 0x277   : > { %p1879_p1 = scmp.lt.u32.totalorder %s1877_s24, %s1873_s28  ;;  %p1881_p3 = scmp.lt.u32.totalorder %s1873_s28, %s2381_s26 }
 0x278   : > { %p1875_p12 = pnand %p1874_p11, %p2080_p4 }
 0x279   : > { %p1880_p2 = por %p1879_p1, %p1878_p0 }
 0x27a   : > { %p1876_p13 = pneg %p1875_p12 }
 0x27b   : > { %p1882_p5 = por %p1881_p3, %p1880_p2 }
 0x27d   : > { %p1883_p6 = pnand %p1882_p5, %p1876_p13 }
 0x27f   : > { %1886 = shalt.err (!%p1883_p6)
}
 0x280   : > { %s2505_s5 = smov 64   ;;  %s1887_s0 = scalar_lea.vmem %s2383_s3, 256 }
 0x281   : > { %1737 = dma.vmem_to_hbm [thread:$0]  (%p2080_p4), %s2375_s2, 256, %s2381_s26, %s1284_s23, %s2505_s5, %s2505_s5, %s1975_s1  }
 0x282   : > { %p1888_p7 = scmp.ne.s32.totalorder %s2383_s3, %s1887_s0  ;;  %s1977_s14 = smov [#allocation6]  }
 0x283   : > { %s1891_s28 = sshll.u32 %s1977_s14, 4  ;;  %s1892_s28 = int_to_ptr.vmem [resolvable:$false] %s1891_s28 }
 0x284   : > { %p1889_p9 = pnand %p1888_p7, %p2080_p4  ;;  %s1893_s12 = scalar_lea.vmem %s1892_s28, 512 }
 0x285   : > { %p1894_p11 = scmp.lt.s32.totalorder %s2383_s3, %s1892_s28  ;;  %p1895_p12 = scmp.lt.s32.totalorder %s1893_s12, %s1887_s0 }
 0x286   : > { %p1890_p10 = pneg %p1889_p9 }
 0x287   : > { %p1896_p13 = por %p1895_p12, %p1894_p11 }
 0x289   : > { %p1897_p0 = pnand %p1896_p13, %p1890_p10 }
 0x28b   : > { %1900 = shalt.err (!%p1897_p0)
}
 0x28c   : > { %s1901_s2 = scalar_lea.hbm %s2389_s13, 256  ;;  %s1905_s24 = scalar_lea.hbm %s2483_s11, 512 }
 0x28d   : > { %p1902_p1 = scmp.ne.s32.totalorder %s2389_s13, %s1901_s2  ;;  %p1906_p5 = scmp.lt.u32.totalorder %s2389_s13, %s2483_s11 }
 0x28e   : > { %p1907_p6 = scmp.lt.u32.totalorder %s1905_s24, %s1901_s2  ;;  %p1909_p9 = scmp.lt.u32.totalorder %s1901_s2, %s2389_s13 }
 0x28f   : > { %p1903_p2 = pnand %p1902_p1, %p2080_p4 }
 0x290   : > { %p1908_p7 = por %p1907_p6, %p1906_p5 }
 0x291   : > { %p1904_p3 = pneg %p1903_p2 }
 0x292   : > { %p1910_p10 = por %p1909_p9, %p1908_p7 }
 0x294   : > { %p1911_p11 = pnand %p1910_p10, %p1904_p3 }
 0x296   : > { %1914 = shalt.err (!%p1911_p11)
}
 0x297   : > { %1738 = dma.vmem_to_hbm [thread:$0]  (%p2080_p4), %s2383_s3, 256, %s2389_s13, %s1284_s23, %s2505_s5, %s2505_s5, %s1975_s1  }
 0x298 PF: > { %p1752_p12 = scmp.ge.s32.totalorder %s1969_s22, 2  ;;  %s1352_s0 = sand.u32 1, %s1949_s17  }
 0x299   : > { %s1353_s14 = scalar_lea.sflag [#allocation3], %s1352_s0 }
 0x29a   : > { %p1743_p13 = pnand %p1752_p12, %p2089_p8 }
 0x29c   : > { %1940 = dma.done.wait (!%p1743_p13), %s1353_s14, 256  }
 0x29d   : > { %1942 = vsyncadd (!%p1743_p13), %s1353_s14, 4294967040  ;;  %s2506_s27 = sadd.s32 4294967294, %s1969_s22  }
 0x29e   : > { %s1361_s28 = sand.u32 1, %s2506_s27  }
 0x29f   : > { %s1362_s12 = scalar_lea.sflag [#allocation5], %s1361_s28 }
 0x2a0   : > { %1944 = dma.done.wait (!%p1743_p13), %s1362_s12, 512  }
 0x2a1   : > { %1946 = vsyncadd (!%p1743_p13), %s1362_s12, 4294966784  ;;  %s28_s22 = sadd.s32 1, %s1969_s22   ;;  %s2507_s17 = smov %s1953_s18 }
 0x2a2   : > { %p25_p4 = scmp.ge.s32.totalorder %s28_s22, 4   ;;  %s2508_s18 = smov %s1957_s19 }
 0x2a3   : > { %s2509_s19 = smov %s2095_s30  ;;  %s2510_s20 = smov %s1965_s21 }
 0x2a4   : > { %s2511_s21 = smov %s2513_s25  ;;  %27 = sbr.rel (!%p25_p4) target bundleno = 13 (0xd), region = 150 }
 0x2ab   :  { %1376 = vsyncpa [#allocation3], 1 }
 0x2ac   :  { %1378 = vsyncpa [#allocation3 + $0x1], 1 }
 0x2ad   :  { %1379 = vsyncpa [#allocation5], 1 }
 0x2ae   :  { %1381 = vsyncpa [#allocation5 + $0x1], 1 }

</bundles_post_ra>
